<compile_context>
chip_gen: v6e
topology: v6e:2x2x1
jax: 0.10.0
libtpu: 0.0.40
codegen_flags: <defaults>
</compile_context>

<pallas_src>
import functools

import jax
import jax.numpy as jnp
from jax.experimental import pallas as pl
from jax.experimental.pallas import tpu as pltpu


# ----------------------------- spec / param helpers --------------------------

def _tok_spec(n, d):
    """Per-batch (1, n, d) block of a (B, n, d) activation slab."""
    return pl.BlockSpec((1, n, d), lambda b: (b, 0, 0))


def _rep_spec(shape):
    """Full-array block (weights / biases); constant index -> loaded once."""
    return pl.BlockSpec(shape, lambda b: (0,) * len(shape))


def _cparams():
    # Batch axis "parallel" -> megacore sharding on v7x; modest VMEM budget.
    return pltpu.CompilerParams(
        dimension_semantics=("parallel",),
        vmem_limit_bytes=48 * 1024 * 1024,
    )


# --------------------------------- kernels -----------------------------------

def _matmul_bias_kernel(x_ref, w_ref, b_ref, o_ref):
    """(N, K) @ (K, D) + (1, D); bf16 MXU operands, f32 accumulation."""
    x = x_ref[0].astype(jnp.bfloat16)
    y = jnp.dot(x, w_ref[...], preferred_element_type=jnp.float32) + b_ref[...]
    o_ref[0] = y.astype(o_ref.dtype)


def _ln_matmul_kernel(x_ref, g_ref, bb_ref, w_ref, wb_ref, o_ref, *, eps):
    """Fused LayerNorm (f32 stats) + bf16 matmul + bias."""
    x = x_ref[0]                                        # (N, D) f32
    mean = jnp.mean(x, axis=-1, keepdims=True)
    xc = x - mean
    var = jnp.mean(xc * xc, axis=-1, keepdims=True)
    h = xc * jax.lax.rsqrt(var + eps) * g_ref[...] + bb_ref[...]
    y = jnp.dot(h.astype(jnp.bfloat16), w_ref[...],
                preferred_element_type=jnp.float32) + wb_ref[...]
    o_ref[0] = y.astype(o_ref.dtype)


def _attn_proj_residual_kernel(qkv_ref, wp_ref, bp_ref, res_ref, o_ref, *,
                               heads, head_dim, dim, scale):
    """Per-batch multi-head attention fused with output proj + residual.

    Each head's (N, head_dim) output is folded through its (head_dim, dim)
    slice of the projection weight and accumulated in f32, so no per-head
    concat / transpose and no extra HBM pass for the proj matmul.
    """
    qkv = qkv_ref[0]                                    # (N, 3*dim) bf16
    acc = res_ref[0] + bp_ref[...]                      # residual + proj bias
    for h in range(heads):                              # static unroll
        lo = h * head_dim
        hi = lo + head_dim
        q = qkv[:, lo:hi]
        k = qkv[:, dim + lo:dim + hi]
        v = qkv[:, 2 * dim + lo:2 * dim + hi]
        # scores (f32): contract over head_dim
        s = jax.lax.dot_general(q, k, (((1,), (1,)), ((), ())),
                                preferred_element_type=jnp.float32) * scale
        m = jnp.max(s, axis=-1, keepdims=True)
        p = jnp.exp(s - m)                              # f32 softmax numerator
        l = jnp.sum(p, axis=-1, keepdims=True)
        o_h = jnp.dot(p.astype(jnp.bfloat16), v,
                      preferred_element_type=jnp.float32)
        # deferred normalization: (N, head_dim) multiply, reciprocal on EUP
        o_h = o_h * pl.reciprocal(l, approx=True)
        acc = acc + jnp.dot(o_h.astype(jnp.bfloat16), wp_ref[lo:hi, :],
                            preferred_element_type=jnp.float32)
    o_ref[0] = acc


def _mlp_block_kernel(x_ref, g_ref, bb_ref, w1_ref, b1_ref, w2_ref, b2_ref,
                      o_ref, *, eps):
    """Fused LayerNorm + fc1 + GELU + fc2 + residual."""
    x = x_ref[0]                                        # (N, D) f32
    mean = jnp.mean(x, axis=-1, keepdims=True)
    xc = x - mean
    var = jnp.mean(xc * xc, axis=-1, keepdims=True)
    h = xc * jax.lax.rsqrt(var + eps) * g_ref[...] + bb_ref[...]
    h1 = jnp.dot(h.astype(jnp.bfloat16), w1_ref[...],
                 preferred_element_type=jnp.float32) + b1_ref[...]
    # TODO(synk): PyTorch nn.GELU default is the exact erf GELU; tanh approx
    # is used here for robust TPU lowering (EUP tanh path).
    h1 = jax.nn.gelu(h1, approximate=True)
    h2 = jnp.dot(h1.astype(jnp.bfloat16), w2_ref[...],
                 preferred_element_type=jnp.float32) + b2_ref[...]
    o_ref[0] = x + h2


# ------------------------------ kernel wrappers -------------------------------

def patch_embed(x, w_bf16, b):
    B, P, K = x.shape
    D = w_bf16.shape[1]
    return pl.pallas_call(
        _matmul_bias_kernel,
        out_shape=jax.ShapeDtypeStruct((B, P, D), jnp.float32),
        grid=(B,),
        in_specs=[_tok_spec(P, K), _rep_spec((K, D)), _rep_spec((1, D))],
        out_specs=_tok_spec(P, D),
        compiler_params=_cparams(),
    )(x, w_bf16, b.reshape(1, D))


def ln_matmul(x, g, b, w_bf16, wb, out_dtype, eps=1e-6):
    B, N, D = x.shape
    O = w_bf16.shape[1]
    return pl.pallas_call(
        functools.partial(_ln_matmul_kernel, eps=eps),
        out_shape=jax.ShapeDtypeStruct((B, N, O), out_dtype),
        grid=(B,),
        in_specs=[_tok_spec(N, D), _rep_spec((1, D)), _rep_spec((1, D)),
                  _rep_spec((D, O)), _rep_spec((1, O))],
        out_specs=_tok_spec(N, O),
        compiler_params=_cparams(),
    )(x, g.reshape(1, D), b.reshape(1, D), w_bf16, wb.reshape(1, O))


def attention_proj_residual(qkv, proj_w_bf16, proj_b, res, *, heads, head_dim,
                            scale):
    B, N, D3 = qkv.shape
    dim = proj_w_bf16.shape[1]
    return pl.pallas_call(
        functools.partial(_attn_proj_residual_kernel, heads=heads,
                          head_dim=head_dim, dim=dim, scale=scale),
        out_shape=jax.ShapeDtypeStruct((B, N, dim), jnp.float32),
        grid=(B,),
        in_specs=[_tok_spec(N, D3), _rep_spec((dim, dim)),
                  _rep_spec((1, dim)), _tok_spec(N, dim)],
        out_specs=_tok_spec(N, dim),
        compiler_params=_cparams(),
    )(qkv, proj_w_bf16, proj_b.reshape(1, dim), res)


def mlp_block(tok, g, b, w1_bf16, b1, w2_bf16, b2, eps=1e-6):
    B, N, D = tok.shape
    Hd = w1_bf16.shape[1]
    return pl.pallas_call(
        functools.partial(_mlp_block_kernel, eps=eps),
        out_shape=jax.ShapeDtypeStruct((B, N, D), jnp.float32),
        grid=(B,),
        in_specs=[_tok_spec(N, D), _rep_spec((1, D)), _rep_spec((1, D)),
                  _rep_spec((D, Hd)), _rep_spec((1, Hd)),
                  _rep_spec((Hd, D)), _rep_spec((1, D))],
        out_specs=_tok_spec(N, D),
        compiler_params=_cparams(),
    )(tok, g.reshape(1, D), b.reshape(1, D), w1_bf16, b1.reshape(1, Hd),
      w2_bf16, b2.reshape(1, D))


# ------------------------ parameters (deterministic) --------------------------

def init_params(key, *, patch, in_chans, dim, depth, heads, mlp_hidden,
                num_classes, num_patches):
    keys = iter(jax.random.split(key, 8 + depth * 8))

    def nrm(shape, std=0.02):
        return jax.random.normal(next(keys), shape, jnp.float32) * std

    params = dict(
        # conv-as-matmul patch embedding; columns flattened in NHWC patch
        # order (ph, pw, C) so the activation needs no NCHW shuffle.
        patch_w=nrm((patch * patch * in_chans, dim)),
        patch_b=jnp.zeros((dim,), jnp.float32),
        cls_token=nrm((1, 1, dim)),
        pos_embed=nrm((1, num_patches + 1, dim)),
        norm_g=jnp.ones((dim,), jnp.float32),
        norm_b=jnp.zeros((dim,), jnp.float32),
        # BNHead (BatchNorm2d running stats + affine, 1x1 conv_seg)
        bn_mean=nrm((dim,), 0.1),
        bn_var=jnp.abs(nrm((dim,), 0.1)) + 1.0,
        bn_g=jnp.ones((dim,), jnp.float32),
        bn_b=jnp.zeros((dim,), jnp.float32),
        seg_w=nrm((dim, num_classes)),
        seg_b=jnp.zeros((num_classes,), jnp.float32),
        blocks=[],
    )
    for _ in range(depth):
        params["blocks"].append(dict(
            ln1_g=jnp.ones((dim,), jnp.float32), ln1_b=jnp.zeros((dim,), jnp.float32),
            qkv_w=nrm((dim, 3 * dim)), qkv_b=jnp.zeros((3 * dim,), jnp.float32),
            proj_w=nrm((dim, dim)), proj_b=jnp.zeros((dim,), jnp.float32),
            ln2_g=jnp.ones((dim,), jnp.float32), ln2_b=jnp.zeros((dim,), jnp.float32),
            fc1_w=nrm((dim, mlp_hidden)), fc1_b=jnp.zeros((mlp_hidden,), jnp.float32),
            fc2_w=nrm((mlp_hidden, dim)), fc2_b=jnp.zeros((dim,), jnp.float32),
        ))
    return params


# ------------------------------- forward pass ---------------------------------

def dino_with_segmentation(params, x_nchw, *, patch, dim, heads, num_classes):
    B, C, H, W = x_nchw.shape
    gh, gw = H // patch, W // patch
    P = gh * gw
    head_dim = dim // heads
    scale = 1.0 / (head_dim ** 0.5)
    bf = lambda a: a.astype(jnp.bfloat16)   # MXU operands in bf16

    # --- DINO ViT backbone ---
    # patch embedding: conv(k=patch, stride=patch) == matmul over NHWC patches
    x_nhwc = jnp.transpose(x_nchw, (0, 2, 3, 1))                 # (B, H, W, C)
    pches = x_nhwc.reshape(B, gh, patch, gw, patch, C)
    pches = pches.transpose(0, 1, 3, 2, 4, 5).reshape(B, P, patch * patch * C)
    tok = patch_embed(pches, bf(params["patch_w"]), params["patch_b"])

    cls = jnp.broadcast_to(params["cls_token"], (B, 1, dim))
    tok = jnp.concatenate([cls, tok], axis=1) + params["pos_embed"]  # (B, N, D)

    for blk in params["blocks"]:
        # 1) LN + QKV projection (qkv kept bf16: downstream it is MXU-only)
        qkv = ln_matmul(tok, blk["ln1_g"], blk["ln1_b"], bf(blk["qkv_w"]),
                        blk["qkv_b"], jnp.bfloat16)
        # 2) multi-head attention + output proj + residual (single kernel)
        tok = attention_proj_residual(qkv, bf(blk["proj_w"]), blk["proj_b"],
                                      tok, heads=heads, head_dim=head_dim,
                                      scale=scale)
        # 3) LN + MLP + residual (single kernel)
        tok = mlp_block(tok, blk["ln2_g"], blk["ln2_b"], bf(blk["fc1_w"]),
                        blk["fc1_b"], bf(blk["fc2_w"]), blk["fc2_b"])

    # --- BNHead: resize(None)/concat(single input) -> BN -> dropout -> 1x1 conv
    # mmseg _transform_inputs resize/concat is identity (single feature map,
    # resize_factors=None); Dropout is eval-mode identity.  Eval-mode
    # BatchNorm2d is an affine transform -> fold it into conv_seg so the head
    # is a pure matmul, fused with the final DINO LayerNorm; pad out-channels
    # to a lane-dense 128 for unmasked stores / full MXU tiles.
    bn_eps = 1e-5
    s = params["bn_g"] * jax.lax.rsqrt(params["bn_var"] + bn_eps)
    t = params["bn_b"] - params["bn_mean"] * s
    w_fold = params["seg_w"] * s[:, None]                         # (dim, ncls)
    b_fold = params["seg_b"] + t @ params["seg_w"]                # (ncls,)
    o_pad = max(128, ((num_classes + 127) // 128) * 128)
    w_pad = jnp.zeros((dim, o_pad), jnp.float32).at[:, :num_classes].set(w_fold)
    b_pad = jnp.zeros((o_pad,), jnp.float32).at[:num_classes].set(b_fold)

    patch_tok = tok[:, 1:, :]                                     # drop cls
    logits = ln_matmul(patch_tok, params["norm_g"], params["norm_b"],
                       bf(w_pad), b_pad, jnp.float32)             # (B, P, 128)
    logits = logits[..., :num_classes].reshape(B, gh, gw, num_classes)
    return logits.transpose(0, 3, 1, 2)                           # NCHW


# ------------------------------------ main -------------------------------------

if __name__ == "__main__":
    PATCH = 8
    IN_CHANS = 3
    DIM = 32          # in_channels of BNHead
    DEPTH = 2
    HEADS = 2
    MLP_HIDDEN = 4 * DIM
    NUM_CLASSES = 5   # out_channels of BNHead
    B, H, W = 2, 32, 32
    NUM_PATCHES = (H // PATCH) * (W // PATCH)

    key = jax.random.PRNGKey(0)
    k_param, k_x = jax.random.split(key)
    params = init_params(k_param, patch=PATCH, in_chans=IN_CHANS, dim=DIM,
                         depth=DEPTH, heads=HEADS, mlp_hidden=MLP_HIDDEN,
                         num_classes=NUM_CLASSES, num_patches=NUM_PATCHES)
    x = jax.random.normal(k_x, (B, IN_CHANS, H, W), jnp.float32)  # NCHW input

    fwd = jax.jit(functools.partial(dino_with_segmentation, patch=PATCH,
                                    dim=DIM, heads=HEADS,
                                    num_classes=NUM_CLASSES))
    out = fwd(params, x)
    jax.block_until_ready(out)
    assert out.shape == (B, NUM_CLASSES, H // PATCH, W // PATCH), out.shape
    print("KERNEL_OK")
</pallas_src>

<mosaic_0001>
module attributes {stable_mosaic.version = 11 : i64} {
  func.func @_matmul_bias_kernel(%arg0: i32, %arg1: memref<1x16x192xf32, #tpu.memory_space<vmem>>, %arg2: memref<192x32xbf16, #tpu.memory_space<vmem>>, %arg3: memref<1x32xf32, #tpu.memory_space<vmem>>, %arg4: memref<1x16x32xf32, #tpu.memory_space<vmem>>) attributes {dimension_semantics = [#tpu.dimension_semantics<parallel>], iteration_bounds = array<i64: 2>, scalar_prefetch = 0 : i64, scratch_operands = 0 : i64, tpu.core_type = #tpu.core_type<tc>, window_params = [{transform_indices = @transform_0, window_bounds = array<i64: 1, 16, 192>}, {pipeline_mode = #tpu.pipeline_mode<synchronous>, transform_indices = @transform_1, window_bounds = array<i64: 192, 32>}, {pipeline_mode = #tpu.pipeline_mode<synchronous>, transform_indices = @transform_2, window_bounds = array<i64: 1, 32>}, {transform_indices = @transform_3, window_bounds = array<i64: 1, 16, 32>}]} {
    %c0 = arith.constant 0 : index
    %c0_0 = arith.constant 0 : index
    %c0_1 = arith.constant 0 : index
    %0 = vector.load %arg1[%c0, %c0_0, %c0_1] : memref<1x16x192xf32, #tpu.memory_space<vmem>>, vector<1x16x192xf32>
    %1 = vector.shape_cast %0 : vector<1x16x192xf32> to vector<16x192xf32>
    %2 = arith.truncf %1 : vector<16x192xf32> to vector<16x192xbf16>
    %c0_2 = arith.constant 0 : index
    %c0_3 = arith.constant 0 : index
    %3 = vector.load %arg2[%c0_2, %c0_3] : memref<192x32xbf16, #tpu.memory_space<vmem>>, vector<192x32xbf16>
    %cst = arith.constant dense<0.000000e+00> : vector<16x32xf32>
    %4 = tpu.matmul %2, %3, %cst {dimension_numbers = #tpu.dot_dimension_numbers<[1], [0], [0], [1], [0, 0, 1, 1], [], []>} : vector<16x192xbf16>, vector<192x32xbf16>, vector<16x32xf32> -> vector<16x32xf32>
    %c0_4 = arith.constant 0 : index
    %c0_5 = arith.constant 0 : index
    %5 = vector.load %arg3[%c0_4, %c0_5] : memref<1x32xf32, #tpu.memory_space<vmem>>, vector<1x32xf32>
    %6 = vector.broadcast %5 : vector<1x32xf32> to vector<16x32xf32>
    %7 = arith.addf %4, %6 : vector<16x32xf32>
    %c0_6 = arith.constant 0 : index
    %c0_7 = arith.constant 0 : index
    %c0_8 = arith.constant 0 : index
    %8 = vector.load %arg4[%c0_6, %c0_7, %c0_8] : memref<1x16x32xf32, #tpu.memory_space<vmem>>, vector<1x16x32xf32>
    %9 = vector.shape_cast %8 : vector<1x16x32xf32> to vector<16x32xf32>
    %10 = vector.shape_cast %7 : vector<16x32xf32> to vector<1x16x32xf32>
    tpu.vector_store %arg4[%c0_6, %c0_7, %c0_8], %10 {strides = array<i32>} : memref<1x16x32xf32, #tpu.memory_space<vmem>>, vector<1x16x32xf32>,
    return
  }
  func.func @transform_0(%arg0: i32) -> (i32, i32, i32) {
    %c0_i32 = arith.constant 0 : i32
    %c0_i32_0 = arith.constant 0 : i32
    %c0_i32_1 = arith.constant 0 : i32
    return %arg0, %c0_i32, %c0_i32_0 : i32, i32, i32
  }
  func.func @transform_1(%arg0: i32) -> (i32, i32) {
    %c0_i32 = arith.constant 0 : i32
    %c0_i32_0 = arith.constant 0 : i32
    %c0_i32_1 = arith.constant 0 : i32
    return %c0_i32, %c0_i32_0 : i32, i32
  }
  func.func @transform_2(%arg0: i32) -> (i32, i32) {
    %c0_i32 = arith.constant 0 : i32
    %c0_i32_0 = arith.constant 0 : i32
    %c0_i32_1 = arith.constant 0 : i32
    return %c0_i32, %c0_i32_0 : i32, i32
  }
  func.func @transform_3(%arg0: i32) -> (i32, i32, i32) {
    %c0_i32 = arith.constant 0 : i32
    %c0_i32_0 = arith.constant 0 : i32
    %c0_i32_1 = arith.constant 0 : i32
    return %arg0, %c0_i32, %c0_i32_0 : i32, i32, i32
  }
}

module attributes {stable_mosaic.version = 11 : i64} {
  func.func @_ln_matmul_kernel(%arg0: i32, %arg1: memref<1x17x32xf32, #tpu.memory_space<vmem>>, %arg2: memref<1x32xf32, #tpu.memory_space<vmem>>, %arg3: memref<1x32xf32, #tpu.memory_space<vmem>>, %arg4: memref<32x96xbf16, #tpu.memory_space<vmem>>, %arg5: memref<1x96xf32, #tpu.memory_space<vmem>>, %arg6: memref<1x17x96xbf16, #tpu.memory_space<vmem>>) attributes {dimension_semantics = [#tpu.dimension_semantics<parallel>], iteration_bounds = array<i64: 2>, scalar_prefetch = 0 : i64, scratch_operands = 0 : i64, tpu.core_type = #tpu.core_type<tc>, window_params = [{transform_indices = @transform_0, window_bounds = array<i64: 1, 17, 32>}, {pipeline_mode = #tpu.pipeline_mode<synchronous>, transform_indices = @transform_1, window_bounds = array<i64: 1, 32>}, {pipeline_mode = #tpu.pipeline_mode<synchronous>, transform_indices = @transform_2, window_bounds = array<i64: 1, 32>}, {pipeline_mode = #tpu.pipeline_mode<synchronous>, transform_indices = @transform_3, window_bounds = array<i64: 32, 96>}, {pipeline_mode = #tpu.pipeline_mode<synchronous>, transform_indices = @transform_4, window_bounds = array<i64: 1, 96>}, {transform_indices = @transform_5, window_bounds = array<i64: 1, 17, 96>}]} {
    %c0 = arith.constant 0 : index
    %c0_0 = arith.constant 0 : index
    %c0_1 = arith.constant 0 : index
    %0 = vector.load %arg1[%c0, %c0_0, %c0_1] : memref<1x17x32xf32, #tpu.memory_space<vmem>>, vector<1x17x32xf32>
    %1 = vector.shape_cast %0 : vector<1x17x32xf32> to vector<17x32xf32>
    %cst = arith.constant dense<0.000000e+00> : vector<17xf32>
    %2 = vector.multi_reduction <add>, %1, %cst [1] : vector<17x32xf32> to vector<17xf32>
    %3 = vector.shape_cast %2 : vector<17xf32> to vector<17x1xf32>
    %cst_2 = arith.constant 3.200000e+01 : f32
    %4 = vector.broadcast %cst_2 : f32 to vector<17x1xf32>
    %5 = arith.divf %3, %4 : vector<17x1xf32>
    %6 = vector.broadcast %5 : vector<17x1xf32> to vector<17x32xf32>
    %7 = arith.subf %1, %6 : vector<17x32xf32>
    %8 = arith.mulf %7, %7 : vector<17x32xf32>
    %cst_3 = arith.constant dense<0.000000e+00> : vector<17xf32>
    %9 = vector.multi_reduction <add>, %8, %cst_3 [1] : vector<17x32xf32> to vector<17xf32>
    %10 = vector.shape_cast %9 : vector<17xf32> to vector<17x1xf32>
    %cst_4 = arith.constant 3.200000e+01 : f32
    %11 = vector.broadcast %cst_4 : f32 to vector<17x1xf32>
    %12 = arith.divf %10, %11 : vector<17x1xf32>
    %cst_5 = arith.constant 9.99999997E-7 : f32
    %13 = vector.broadcast %cst_5 : f32 to vector<17x1xf32>
    %14 = arith.addf %12, %13 : vector<17x1xf32>
    %15 = math.rsqrt %14 : vector<17x1xf32>
    %16 = vector.broadcast %15 : vector<17x1xf32> to vector<17x32xf32>
    %17 = arith.mulf %7, %16 : vector<17x32xf32>
    %c0_6 = arith.constant 0 : index
    %c0_7 = arith.constant 0 : index
    %18 = vector.load %arg2[%c0_6, %c0_7] : memref<1x32xf32, #tpu.memory_space<vmem>>, vector<1x32xf32>
    %19 = vector.broadcast %18 : vector<1x32xf32> to vector<17x32xf32>
    %20 = arith.mulf %17, %19 : vector<17x32xf32>
    %c0_8 = arith.constant 0 : index
    %c0_9 = arith.constant 0 : index
    %21 = vector.load %arg3[%c0_8, %c0_9] : memref<1x32xf32, #tpu.memory_space<vmem>>, vector<1x32xf32>
    %22 = vector.broadcast %21 : vector<1x32xf32> to vector<17x32xf32>
    %23 = arith.addf %20, %22 : vector<17x32xf32>
    %24 = arith.truncf %23 : vector<17x32xf32> to vector<17x32xbf16>
    %c0_10 = arith.constant 0 : index
    %c0_11 = arith.constant 0 : index
    %25 = vector.load %arg4[%c0_10, %c0_11] : memref<32x96xbf16, #tpu.memory_space<vmem>>, vector<32x96xbf16>
    %cst_12 = arith.constant dense<0.000000e+00> : vector<17x96xf32>
    %26 = tpu.matmul %24, %25, %cst_12 {dimension_numbers = #tpu.dot_dimension_numbers<[1], [0], [0], [1], [0, 0, 1, 1], [], []>} : vector<17x32xbf16>, vector<32x96xbf16>, vector<17x96xf32> -> vector<17x96xf32>
    %c0_13 = arith.constant 0 : index
    %c0_14 = arith.constant 0 : index
    %27 = vector.load %arg5[%c0_13, %c0_14] : memref<1x96xf32, #tpu.memory_space<vmem>>, vector<1x96xf32>
    %28 = vector.broadcast %27 : vector<1x96xf32> to vector<17x96xf32>
    %29 = arith.addf %26, %28 : vector<17x96xf32>
    %30 = arith.truncf %29 : vector<17x96xf32> to vector<17x96xbf16>
    %c0_15 = arith.constant 0 : index
    %c0_16 = arith.constant 0 : index
    %c0_17 = arith.constant 0 : index
    %31 = vector.load %arg6[%c0_15, %c0_16, %c0_17] : memref<1x17x96xbf16, #tpu.memory_space<vmem>>, vector<1x17x96xbf16>
    %32 = vector.shape_cast %31 : vector<1x17x96xbf16> to vector<17x96xbf16>
    %33 = vector.shape_cast %30 : vector<17x96xbf16> to vector<1x17x96xbf16>
    tpu.vector_store %arg6[%c0_15, %c0_16, %c0_17], %33 {strides = array<i32>} : memref<1x17x96xbf16, #tpu.memory_space<vmem>>, vector<1x17x96xbf16>,
    return
  }
  func.func @transform_0(%arg0: i32) -> (i32, i32, i32) {
    %c0_i32 = arith.constant 0 : i32
    %c0_i32_0 = arith.constant 0 : i32
    %c0_i32_1 = arith.constant 0 : i32
    return %arg0, %c0_i32, %c0_i32_0 : i32, i32, i32
  }
  func.func @transform_1(%arg0: i32) -> (i32, i32) {
    %c0_i32 = arith.constant 0 : i32
    %c0_i32_0 = arith.constant 0 : i32
    %c0_i32_1 = arith.constant 0 : i32
    return %c0_i32, %c0_i32_0 : i32, i32
  }
  func.func @transform_2(%arg0: i32) -> (i32, i32) {
    %c0_i32 = arith.constant 0 : i32
    %c0_i32_0 = arith.constant 0 : i32
    %c0_i32_1 = arith.constant 0 : i32
    return %c0_i32, %c0_i32_0 : i32, i32
  }
  func.func @transform_3(%arg0: i32) -> (i32, i32) {
    %c0_i32 = arith.constant 0 : i32
    %c0_i32_0 = arith.constant 0 : i32
    %c0_i32_1 = arith.constant 0 : i32
    return %c0_i32, %c0_i32_0 : i32, i32
  }
  func.func @transform_4(%arg0: i32) -> (i32, i32) {
    %c0_i32 = arith.constant 0 : i32
    %c0_i32_0 = arith.constant 0 : i32
    %c0_i32_1 = arith.constant 0 : i32
    return %c0_i32, %c0_i32_0 : i32, i32
  }
  func.func @transform_5(%arg0: i32) -> (i32, i32, i32) {
    %c0_i32 = arith.constant 0 : i32
    %c0_i32_0 = arith.constant 0 : i32
    %c0_i32_1 = arith.constant 0 : i32
    return %arg0, %c0_i32, %c0_i32_0 : i32, i32, i32
  }
}

module attributes {stable_mosaic.version = 11 : i64} {
  func.func @_attn_proj_residual_kernel(%arg0: i32, %arg1: memref<1x17x96xbf16, #tpu.memory_space<vmem>>, %arg2: memref<32x32xbf16, #tpu.memory_space<vmem>>, %arg3: memref<1x32xf32, #tpu.memory_space<vmem>>, %arg4: memref<1x17x32xf32, #tpu.memory_space<vmem>>, %arg5: memref<1x17x32xf32, #tpu.memory_space<vmem>>) attributes {dimension_semantics = [#tpu.dimension_semantics<parallel>], iteration_bounds = array<i64: 2>, scalar_prefetch = 0 : i64, scratch_operands = 0 : i64, tpu.core_type = #tpu.core_type<tc>, window_params = [{transform_indices = @transform_0, window_bounds = array<i64: 1, 17, 96>}, {pipeline_mode = #tpu.pipeline_mode<synchronous>, transform_indices = @transform_1, window_bounds = array<i64: 32, 32>}, {pipeline_mode = #tpu.pipeline_mode<synchronous>, transform_indices = @transform_2, window_bounds = array<i64: 1, 32>}, {transform_indices = @transform_3, window_bounds = array<i64: 1, 17, 32>}, {transform_indices = @transform_4, window_bounds = array<i64: 1, 17, 32>}]} {
    %c0 = arith.constant 0 : index
    %c0_0 = arith.constant 0 : index
    %c0_1 = arith.constant 0 : index
    %0 = vector.load %arg1[%c0, %c0_0, %c0_1] : memref<1x17x96xbf16, #tpu.memory_space<vmem>>, vector<1x17x96xbf16>
    %1 = vector.shape_cast %0 : vector<1x17x96xbf16> to vector<17x96xbf16>
    %c0_2 = arith.constant 0 : index
    %c0_3 = arith.constant 0 : index
    %c0_4 = arith.constant 0 : index
    %2 = vector.load %arg4[%c0_2, %c0_3, %c0_4] : memref<1x17x32xf32, #tpu.memory_space<vmem>>, vector<1x17x32xf32>
    %3 = vector.shape_cast %2 : vector<1x17x32xf32> to vector<17x32xf32>
    %c0_5 = arith.constant 0 : index
    %c0_6 = arith.constant 0 : index
    %4 = vector.load %arg3[%c0_5, %c0_6] : memref<1x32xf32, #tpu.memory_space<vmem>>, vector<1x32xf32>
    %5 = vector.broadcast %4 : vector<1x32xf32> to vector<17x32xf32>
    %6 = arith.addf %3, %5 : vector<17x32xf32>
    %7 = vector.extract_strided_slice %1 {offsets = [0, 0], sizes = [17, 16], strides = [1, 1]} : vector<17x96xbf16> to vector<17x16xbf16>
    %8 = vector.extract_strided_slice %1 {offsets = [0, 32], sizes = [17, 16], strides = [1, 1]} : vector<17x96xbf16> to vector<17x16xbf16>
    %9 = vector.extract_strided_slice %1 {offsets = [0, 64], sizes = [17, 16], strides = [1, 1]} : vector<17x96xbf16> to vector<17x16xbf16>
    %cst = arith.constant dense<0.000000e+00> : vector<17x17xf32>
    %10 = tpu.matmul %7, %8, %cst {dimension_numbers = #tpu.dot_dimension_numbers<[1], [1], [0], [0], [0, 0, 1, 0], [], []>} : vector<17x16xbf16>, vector<17x16xbf16>, vector<17x17xf32> -> vector<17x17xf32>
    %cst_7 = arith.constant 2.500000e-01 : f32
    %11 = vector.broadcast %cst_7 : f32 to vector<17x17xf32>
    %12 = arith.mulf %10, %11 : vector<17x17xf32>
    %cst_8 = arith.constant dense<0xFF800000> : vector<17xf32>
    %13 = vector.multi_reduction <maximumf>, %12, %cst_8 [1] : vector<17x17xf32> to vector<17xf32>
    %14 = vector.shape_cast %13 : vector<17xf32> to vector<17x1xf32>
    %15 = vector.broadcast %14 : vector<17x1xf32> to vector<17x17xf32>
    %16 = arith.subf %12, %15 : vector<17x17xf32>
    %17 = math.exp %16 : vector<17x17xf32>
    %cst_9 = arith.constant dense<0.000000e+00> : vector<17xf32>
    %18 = vector.multi_reduction <add>, %17, %cst_9 [1] : vector<17x17xf32> to vector<17xf32>
    %19 = vector.shape_cast %18 : vector<17xf32> to vector<17x1xf32>
    %20 = arith.truncf %17 : vector<17x17xf32> to vector<17x17xbf16>
    %cst_10 = arith.constant dense<0.000000e+00> : vector<17x16xf32>
    %21 = tpu.matmul %20, %9, %cst_10 {dimension_numbers = #tpu.dot_dimension_numbers<[1], [0], [0], [1], [0, 0, 1, 1], [], []>} : vector<17x17xbf16>, vector<17x16xbf16>, vector<17x16xf32> -> vector<17x16xf32>
    %22 = tpu.reciprocal %19 {approx = true} : vector<17x1xf32> -> vector<17x1xf32>
    %23 = vector.broadcast %22 : vector<17x1xf32> to vector<17x16xf32>
    %24 = arith.mulf %21, %23 : vector<17x16xf32>
    %25 = arith.truncf %24 : vector<17x16xf32> to vector<17x16xbf16>
    %c0_11 = arith.constant 0 : index
    %c0_12 = arith.constant 0 : index
    %26 = vector.load %arg2[%c0_11, %c0_12] : memref<32x32xbf16, #tpu.memory_space<vmem>>, vector<16x32xbf16>
    %cst_13 = arith.constant dense<0.000000e+00> : vector<17x32xf32>
    %27 = tpu.matmul %25, %26, %cst_13 {dimension_numbers = #tpu.dot_dimension_numbers<[1], [0], [0], [1], [0, 0, 1, 1], [], []>} : vector<17x16xbf16>, vector<16x32xbf16>, vector<17x32xf32> -> vector<17x32xf32>
    %28 = arith.addf %6, %27 : vector<17x32xf32>
    %29 = vector.extract_strided_slice %1 {offsets = [0, 16], sizes = [17, 16], strides = [1, 1]} : vector<17x96xbf16> to vector<17x16xbf16>
    %30 = vector.extract_strided_slice %1 {offsets = [0, 48], sizes = [17, 16], strides = [1, 1]} : vector<17x96xbf16> to vector<17x16xbf16>
    %31 = vector.extract_strided_slice %1 {offsets = [0, 80], sizes = [17, 16], strides = [1, 1]} : vector<17x96xbf16> to vector<17x16xbf16>
    %cst_14 = arith.constant dense<0.000000e+00> : vector<17x17xf32>
    %32 = tpu.matmul %29, %30, %cst_14 {dimension_numbers = #tpu.dot_dimension_numbers<[1], [1], [0], [0], [0, 0, 1, 0], [], []>} : vector<17x16xbf16>, vector<17x16xbf16>, vector<17x17xf32> -> vector<17x17xf32>
    %cst_15 = arith.constant 2.500000e-01 : f32
    %33 = vector.broadcast %cst_15 : f32 to vector<17x17xf32>
    %34 = arith.mulf %32, %33 : vector<17x17xf32>
    %cst_16 = arith.constant dense<0xFF800000> : vector<17xf32>
    %35 = vector.multi_reduction <maximumf>, %34, %cst_16 [1] : vector<17x17xf32> to vector<17xf32>
    %36 = vector.shape_cast %35 : vector<17xf32> to vector<17x1xf32>
    %37 = vector.broadcast %36 : vector<17x1xf32> to vector<17x17xf32>
    %38 = arith.subf %34, %37 : vector<17x17xf32>
    %39 = math.exp %38 : vector<17x17xf32>
    %cst_17 = arith.constant dense<0.000000e+00> : vector<17xf32>
    %40 = vector.multi_reduction <add>, %39, %cst_17 [1] : vector<17x17xf32> to vector<17xf32>
    %41 = vector.shape_cast %40 : vector<17xf32> to vector<17x1xf32>
    %42 = arith.truncf %39 : vector<17x17xf32> to vector<17x17xbf16>
    %cst_18 = arith.constant dense<0.000000e+00> : vector<17x16xf32>
    %43 = tpu.matmul %42, %31, %cst_18 {dimension_numbers = #tpu.dot_dimension_numbers<[1], [0], [0], [1], [0, 0, 1, 1], [], []>} : vector<17x17xbf16>, vector<17x16xbf16>, vector<17x16xf32> -> vector<17x16xf32>
    %44 = tpu.reciprocal %41 {approx = true} : vector<17x1xf32> -> vector<17x1xf32>
    %45 = vector.broadcast %44 : vector<17x1xf32> to vector<17x16xf32>
    %46 = arith.mulf %43, %45 : vector<17x16xf32>
    %47 = arith.truncf %46 : vector<17x16xf32> to vector<17x16xbf16>
    %c16 = arith.constant 16 : index
    %c0_19 = arith.constant 0 : index
    %48 = vector.load %arg2[%c16, %c0_19] : memref<32x32xbf16, #tpu.memory_space<vmem>>, vector<16x32xbf16>
    %cst_20 = arith.constant dense<0.000000e+00> : vector<17x32xf32>
    %49 = tpu.matmul %47, %48, %cst_20 {dimension_numbers = #tpu.dot_dimension_numbers<[1], [0], [0], [1], [0, 0, 1, 1], [], []>} : vector<17x16xbf16>, vector<16x32xbf16>, vector<17x32xf32> -> vector<17x32xf32>
    %50 = arith.addf %28, %49 : vector<17x32xf32>
    %c0_21 = arith.constant 0 : index
    %c0_22 = arith.constant 0 : index
    %c0_23 = arith.constant 0 : index
    %51 = vector.load %arg5[%c0_21, %c0_22, %c0_23] : memref<1x17x32xf32, #tpu.memory_space<vmem>>, vector<1x17x32xf32>
    %52 = vector.shape_cast %51 : vector<1x17x32xf32> to vector<17x32xf32>
    %53 = vector.shape_cast %50 : vector<17x32xf32> to vector<1x17x32xf32>
    tpu.vector_store %arg5[%c0_21, %c0_22, %c0_23], %53 {strides = array<i32>} : memref<1x17x32xf32, #tpu.memory_space<vmem>>, vector<1x17x32xf32>,
    return
  }
  func.func @transform_0(%arg0: i32) -> (i32, i32, i32) {
    %c0_i32 = arith.constant 0 : i32
    %c0_i32_0 = arith.constant 0 : i32
    %c0_i32_1 = arith.constant 0 : i32
    return %arg0, %c0_i32, %c0_i32_0 : i32, i32, i32
  }
  func.func @transform_1(%arg0: i32) -> (i32, i32) {
    %c0_i32 = arith.constant 0 : i32
    %c0_i32_0 = arith.constant 0 : i32
    %c0_i32_1 = arith.constant 0 : i32
    return %c0_i32, %c0_i32_0 : i32, i32
  }
  func.func @transform_2(%arg0: i32) -> (i32, i32) {
    %c0_i32 = arith.constant 0 : i32
    %c0_i32_0 = arith.constant 0 : i32
    %c0_i32_1 = arith.constant 0 : i32
    return %c0_i32, %c0_i32_0 : i32, i32
  }
  func.func @transform_3(%arg0: i32) -> (i32, i32, i32) {
    %c0_i32 = arith.constant 0 : i32
    %c0_i32_0 = arith.constant 0 : i32
    %c0_i32_1 = arith.constant 0 : i32
    return %arg0, %c0_i32, %c0_i32_0 : i32, i32, i32
  }
  func.func @transform_4(%arg0: i32) -> (i32, i32, i32) {
    %c0_i32 = arith.constant 0 : i32
    %c0_i32_0 = arith.constant 0 : i32
    %c0_i32_1 = arith.constant 0 : i32
    return %arg0, %c0_i32, %c0_i32_0 : i32, i32, i32
  }
}

module attributes {stable_mosaic.version = 11 : i64} {
  func.func @_mlp_block_kernel(%arg0: i32, %arg1: memref<1x17x32xf32, #tpu.memory_space<vmem>>, %arg2: memref<1x32xf32, #tpu.memory_space<vmem>>, %arg3: memref<1x32xf32, #tpu.memory_space<vmem>>, %arg4: memref<32x128xbf16, #tpu.memory_space<vmem>>, %arg5: memref<1x128xf32, #tpu.memory_space<vmem>>, %arg6: memref<128x32xbf16, #tpu.memory_space<vmem>>, %arg7: memref<1x32xf32, #tpu.memory_space<vmem>>, %arg8: memref<1x17x32xf32, #tpu.memory_space<vmem>>) attributes {dimension_semantics = [#tpu.dimension_semantics<parallel>], iteration_bounds = array<i64: 2>, scalar_prefetch = 0 : i64, scratch_operands = 0 : i64, tpu.core_type = #tpu.core_type<tc>, window_params = [{transform_indices = @transform_0, window_bounds = array<i64: 1, 17, 32>}, {pipeline_mode = #tpu.pipeline_mode<synchronous>, transform_indices = @transform_1, window_bounds = array<i64: 1, 32>}, {pipeline_mode = #tpu.pipeline_mode<synchronous>, transform_indices = @transform_2, window_bounds = array<i64: 1, 32>}, {pipeline_mode = #tpu.pipeline_mode<synchronous>, transform_indices = @transform_3, window_bounds = array<i64: 32, 128>}, {pipeline_mode = #tpu.pipeline_mode<synchronous>, transform_indices = @transform_4, window_bounds = array<i64: 1, 128>}, {pipeline_mode = #tpu.pipeline_mode<synchronous>, transform_indices = @transform_5, window_bounds = array<i64: 128, 32>}, {pipeline_mode = #tpu.pipeline_mode<synchronous>, transform_indices = @transform_6, window_bounds = array<i64: 1, 32>}, {transform_indices = @transform_7, window_bounds = array<i64: 1, 17, 32>}]} {
    %c0 = arith.constant 0 : index
    %c0_0 = arith.constant 0 : index
    %c0_1 = arith.constant 0 : index
    %0 = vector.load %arg1[%c0, %c0_0, %c0_1] : memref<1x17x32xf32, #tpu.memory_space<vmem>>, vector<1x17x32xf32>
    %1 = vector.shape_cast %0 : vector<1x17x32xf32> to vector<17x32xf32>
    %cst = arith.constant dense<0.000000e+00> : vector<17xf32>
    %2 = vector.multi_reduction <add>, %1, %cst [1] : vector<17x32xf32> to vector<17xf32>
    %3 = vector.shape_cast %2 : vector<17xf32> to vector<17x1xf32>
    %cst_2 = arith.constant 3.200000e+01 : f32
    %4 = vector.broadcast %cst_2 : f32 to vector<17x1xf32>
    %5 = arith.divf %3, %4 : vector<17x1xf32>
    %6 = vector.broadcast %5 : vector<17x1xf32> to vector<17x32xf32>
    %7 = arith.subf %1, %6 : vector<17x32xf32>
    %8 = arith.mulf %7, %7 : vector<17x32xf32>
    %cst_3 = arith.constant dense<0.000000e+00> : vector<17xf32>
    %9 = vector.multi_reduction <add>, %8, %cst_3 [1] : vector<17x32xf32> to vector<17xf32>
    %10 = vector.shape_cast %9 : vector<17xf32> to vector<17x1xf32>
    %cst_4 = arith.constant 3.200000e+01 : f32
    %11 = vector.broadcast %cst_4 : f32 to vector<17x1xf32>
    %12 = arith.divf %10, %11 : vector<17x1xf32>
    %cst_5 = arith.constant 9.99999997E-7 : f32
    %13 = vector.broadcast %cst_5 : f32 to vector<17x1xf32>
    %14 = arith.addf %12, %13 : vector<17x1xf32>
    %15 = math.rsqrt %14 : vector<17x1xf32>
    %16 = vector.broadcast %15 : vector<17x1xf32> to vector<17x32xf32>
    %17 = arith.mulf %7, %16 : vector<17x32xf32>
    %c0_6 = arith.constant 0 : index
    %c0_7 = arith.constant 0 : index
    %18 = vector.load %arg2[%c0_6, %c0_7] : memref<1x32xf32, #tpu.memory_space<vmem>>, vector<1x32xf32>
    %19 = vector.broadcast %18 : vector<1x32xf32> to vector<17x32xf32>
    %20 = arith.mulf %17, %19 : vector<17x32xf32>
    %c0_8 = arith.constant 0 : index
    %c0_9 = arith.constant 0 : index
    %21 = vector.load %arg3[%c0_8, %c0_9] : memref<1x32xf32, #tpu.memory_space<vmem>>, vector<1x32xf32>
    %22 = vector.broadcast %21 : vector<1x32xf32> to vector<17x32xf32>
    %23 = arith.addf %20, %22 : vector<17x32xf32>
    %24 = arith.truncf %23 : vector<17x32xf32> to vector<17x32xbf16>
    %c0_10 = arith.constant 0 : index
    %c0_11 = arith.constant 0 : index
    %25 = vector.load %arg4[%c0_10, %c0_11] : memref<32x128xbf16, #tpu.memory_space<vmem>>, vector<32x128xbf16>
    %cst_12 = arith.constant dense<0.000000e+00> : vector<17x128xf32>
    %26 = tpu.matmul %24, %25, %cst_12 {dimension_numbers = #tpu.dot_dimension_numbers<[1], [0], [0], [1], [0, 0, 1, 1], [], []>} : vector<17x32xbf16>, vector<32x128xbf16>, vector<17x128xf32> -> vector<17x128xf32>
    %c0_13 = arith.constant 0 : index
    %c0_14 = arith.constant 0 : index
    %27 = vector.load %arg5[%c0_13, %c0_14] : memref<1x128xf32, #tpu.memory_space<vmem>>, vector<1x128xf32>
    %28 = vector.broadcast %27 : vector<1x128xf32> to vector<17x128xf32>
    %29 = arith.addf %26, %28 : vector<17x128xf32>
    %30 = arith.mulf %29, %29 : vector<17x128xf32>
    %31 = arith.mulf %29, %30 : vector<17x128xf32>
    %cst_15 = arith.constant 4.471500e-02 : f32
    %32 = vector.broadcast %cst_15 : f32 to vector<17x128xf32>
    %33 = arith.mulf %32, %31 : vector<17x128xf32>
    %34 = arith.addf %29, %33 : vector<17x128xf32>
    %cst_16 = arith.constant 0.797884583 : f32
    %35 = vector.broadcast %cst_16 : f32 to vector<17x128xf32>
    %36 = arith.mulf %35, %34 : vector<17x128xf32>
    %37 = math.tanh %36 : vector<17x128xf32>
    %cst_17 = arith.constant 1.000000e+00 : f32
    %38 = vector.broadcast %cst_17 : f32 to vector<17x128xf32>
    %39 = arith.addf %38, %37 : vector<17x128xf32>
    %cst_18 = arith.constant 5.000000e-01 : f32
    %40 = vector.broadcast %cst_18 : f32 to vector<17x128xf32>
    %41 = arith.mulf %40, %39 : vector<17x128xf32>
    %42 = arith.mulf %29, %41 : vector<17x128xf32>
    %43 = arith.truncf %42 : vector<17x128xf32> to vector<17x128xbf16>
    %c0_19 = arith.constant 0 : index
    %c0_20 = arith.constant 0 : index
    %44 = vector.load %arg6[%c0_19, %c0_20] : memref<128x32xbf16, #tpu.memory_space<vmem>>, vector<128x32xbf16>
    %cst_21 = arith.constant dense<0.000000e+00> : vector<17x32xf32>
    %45 = tpu.matmul %43, %44, %cst_21 {dimension_numbers = #tpu.dot_dimension_numbers<[1], [0], [0], [1], [0, 0, 1, 1], [], []>} : vector<17x128xbf16>, vector<128x32xbf16>, vector<17x32xf32> -> vector<17x32xf32>
    %c0_22 = arith.constant 0 : index
    %c0_23 = arith.constant 0 : index
    %46 = vector.load %arg7[%c0_22, %c0_23] : memref<1x32xf32, #tpu.memory_space<vmem>>, vector<1x32xf32>
    %47 = vector.broadcast %46 : vector<1x32xf32> to vector<17x32xf32>
    %48 = arith.addf %45, %47 : vector<17x32xf32>
    %49 = arith.addf %1, %48 : vector<17x32xf32>
    %c0_24 = arith.constant 0 : index
    %c0_25 = arith.constant 0 : index
    %c0_26 = arith.constant 0 : index
    %50 = vector.load %arg8[%c0_24, %c0_25, %c0_26] : memref<1x17x32xf32, #tpu.memory_space<vmem>>, vector<1x17x32xf32>
    %51 = vector.shape_cast %50 : vector<1x17x32xf32> to vector<17x32xf32>
    %52 = vector.shape_cast %49 : vector<17x32xf32> to vector<1x17x32xf32>
    tpu.vector_store %arg8[%c0_24, %c0_25, %c0_26], %52 {strides = array<i32>} : memref<1x17x32xf32, #tpu.memory_space<vmem>>, vector<1x17x32xf32>,
    return
  }
  func.func @transform_0(%arg0: i32) -> (i32, i32, i32) {
    %c0_i32 = arith.constant 0 : i32
    %c0_i32_0 = arith.constant 0 : i32
    %c0_i32_1 = arith.constant 0 : i32
    return %arg0, %c0_i32, %c0_i32_0 : i32, i32, i32
  }
  func.func @transform_1(%arg0: i32) -> (i32, i32) {
    %c0_i32 = arith.constant 0 : i32
    %c0_i32_0 = arith.constant 0 : i32
    %c0_i32_1 = arith.constant 0 : i32
    return %c0_i32, %c0_i32_0 : i32, i32
  }
  func.func @transform_2(%arg0: i32) -> (i32, i32) {
    %c0_i32 = arith.constant 0 : i32
    %c0_i32_0 = arith.constant 0 : i32
    %c0_i32_1 = arith.constant 0 : i32
    return %c0_i32, %c0_i32_0 : i32, i32
  }
  func.func @transform_3(%arg0: i32) -> (i32, i32) {
    %c0_i32 = arith.constant 0 : i32
    %c0_i32_0 = arith.constant 0 : i32
    %c0_i32_1 = arith.constant 0 : i32
    return %c0_i32, %c0_i32_0 : i32, i32
  }
  func.func @transform_4(%arg0: i32) -> (i32, i32) {
    %c0_i32 = arith.constant 0 : i32
    %c0_i32_0 = arith.constant 0 : i32
    %c0_i32_1 = arith.constant 0 : i32
    return %c0_i32, %c0_i32_0 : i32, i32
  }
  func.func @transform_5(%arg0: i32) -> (i32, i32) {
    %c0_i32 = arith.constant 0 : i32
    %c0_i32_0 = arith.constant 0 : i32
    %c0_i32_1 = arith.constant 0 : i32
    return %c0_i32, %c0_i32_0 : i32, i32
  }
  func.func @transform_6(%arg0: i32) -> (i32, i32) {
    %c0_i32 = arith.constant 0 : i32
    %c0_i32_0 = arith.constant 0 : i32
    %c0_i32_1 = arith.constant 0 : i32
    return %c0_i32, %c0_i32_0 : i32, i32
  }
  func.func @transform_7(%arg0: i32) -> (i32, i32, i32) {
    %c0_i32 = arith.constant 0 : i32
    %c0_i32_0 = arith.constant 0 : i32
    %c0_i32_1 = arith.constant 0 : i32
    return %arg0, %c0_i32, %c0_i32_0 : i32, i32, i32
  }
}

module attributes {stable_mosaic.version = 11 : i64} {
  func.func @_ln_matmul_kernel(%arg0: i32, %arg1: memref<1x16x32xf32, #tpu.memory_space<vmem>>, %arg2: memref<1x32xf32, #tpu.memory_space<vmem>>, %arg3: memref<1x32xf32, #tpu.memory_space<vmem>>, %arg4: memref<32x128xbf16, #tpu.memory_space<vmem>>, %arg5: memref<1x128xf32, #tpu.memory_space<vmem>>, %arg6: memref<1x16x128xf32, #tpu.memory_space<vmem>>) attributes {dimension_semantics = [#tpu.dimension_semantics<parallel>], iteration_bounds = array<i64: 2>, scalar_prefetch = 0 : i64, scratch_operands = 0 : i64, tpu.core_type = #tpu.core_type<tc>, window_params = [{transform_indices = @transform_0, window_bounds = array<i64: 1, 16, 32>}, {pipeline_mode = #tpu.pipeline_mode<synchronous>, transform_indices = @transform_1, window_bounds = array<i64: 1, 32>}, {pipeline_mode = #tpu.pipeline_mode<synchronous>, transform_indices = @transform_2, window_bounds = array<i64: 1, 32>}, {pipeline_mode = #tpu.pipeline_mode<synchronous>, transform_indices = @transform_3, window_bounds = array<i64: 32, 128>}, {pipeline_mode = #tpu.pipeline_mode<synchronous>, transform_indices = @transform_4, window_bounds = array<i64: 1, 128>}, {transform_indices = @transform_5, window_bounds = array<i64: 1, 16, 128>}]} {
    %c0 = arith.constant 0 : index
    %c0_0 = arith.constant 0 : index
    %c0_1 = arith.constant 0 : index
    %0 = vector.load %arg1[%c0, %c0_0, %c0_1] : memref<1x16x32xf32, #tpu.memory_space<vmem>>, vector<1x16x32xf32>
    %1 = vector.shape_cast %0 : vector<1x16x32xf32> to vector<16x32xf32>
    %cst = arith.constant dense<0.000000e+00> : vector<16xf32>
    %2 = vector.multi_reduction <add>, %1, %cst [1] : vector<16x32xf32> to vector<16xf32>
    %3 = vector.shape_cast %2 : vector<16xf32> to vector<16x1xf32>
    %cst_2 = arith.constant 3.200000e+01 : f32
    %4 = vector.broadcast %cst_2 : f32 to vector<16x1xf32>
    %5 = arith.divf %3, %4 : vector<16x1xf32>
    %6 = vector.broadcast %5 : vector<16x1xf32> to vector<16x32xf32>
    %7 = arith.subf %1, %6 : vector<16x32xf32>
    %8 = arith.mulf %7, %7 : vector<16x32xf32>
    %cst_3 = arith.constant dense<0.000000e+00> : vector<16xf32>
    %9 = vector.multi_reduction <add>, %8, %cst_3 [1] : vector<16x32xf32> to vector<16xf32>
    %10 = vector.shape_cast %9 : vector<16xf32> to vector<16x1xf32>
    %cst_4 = arith.constant 3.200000e+01 : f32
    %11 = vector.broadcast %cst_4 : f32 to vector<16x1xf32>
    %12 = arith.divf %10, %11 : vector<16x1xf32>
    %cst_5 = arith.constant 9.99999997E-7 : f32
    %13 = vector.broadcast %cst_5 : f32 to vector<16x1xf32>
    %14 = arith.addf %12, %13 : vector<16x1xf32>
    %15 = math.rsqrt %14 : vector<16x1xf32>
    %16 = vector.broadcast %15 : vector<16x1xf32> to vector<16x32xf32>
    %17 = arith.mulf %7, %16 : vector<16x32xf32>
    %c0_6 = arith.constant 0 : index
    %c0_7 = arith.constant 0 : index
    %18 = vector.load %arg2[%c0_6, %c0_7] : memref<1x32xf32, #tpu.memory_space<vmem>>, vector<1x32xf32>
    %19 = vector.broadcast %18 : vector<1x32xf32> to vector<16x32xf32>
    %20 = arith.mulf %17, %19 : vector<16x32xf32>
    %c0_8 = arith.constant 0 : index
    %c0_9 = arith.constant 0 : index
    %21 = vector.load %arg3[%c0_8, %c0_9] : memref<1x32xf32, #tpu.memory_space<vmem>>, vector<1x32xf32>
    %22 = vector.broadcast %21 : vector<1x32xf32> to vector<16x32xf32>
    %23 = arith.addf %20, %22 : vector<16x32xf32>
    %24 = arith.truncf %23 : vector<16x32xf32> to vector<16x32xbf16>
    %c0_10 = arith.constant 0 : index
    %c0_11 = arith.constant 0 : index
    %25 = vector.load %arg4[%c0_10, %c0_11] : memref<32x128xbf16, #tpu.memory_space<vmem>>, vector<32x128xbf16>
    %cst_12 = arith.constant dense<0.000000e+00> : vector<16x128xf32>
    %26 = tpu.matmul %24, %25, %cst_12 {dimension_numbers = #tpu.dot_dimension_numbers<[1], [0], [0], [1], [0, 0, 1, 1], [], []>} : vector<16x32xbf16>, vector<32x128xbf16>, vector<16x128xf32> -> vector<16x128xf32>
    %c0_13 = arith.constant 0 : index
    %c0_14 = arith.constant 0 : index
    %27 = vector.load %arg5[%c0_13, %c0_14] : memref<1x128xf32, #tpu.memory_space<vmem>>, vector<1x128xf32>
    %28 = vector.broadcast %27 : vector<1x128xf32> to vector<16x128xf32>
    %29 = arith.addf %26, %28 : vector<16x128xf32>
    %c0_15 = arith.constant 0 : index
    %c0_16 = arith.constant 0 : index
    %c0_17 = arith.constant 0 : index
    %30 = vector.load %arg6[%c0_15, %c0_16, %c0_17] : memref<1x16x128xf32, #tpu.memory_space<vmem>>, vector<1x16x128xf32>
    %31 = vector.shape_cast %30 : vector<1x16x128xf32> to vector<16x128xf32>
    %32 = vector.shape_cast %29 : vector<16x128xf32> to vector<1x16x128xf32>
    tpu.vector_store %arg6[%c0_15, %c0_16, %c0_17], %32 {strides = array<i32>} : memref<1x16x128xf32, #tpu.memory_space<vmem>>, vector<1x16x128xf32>,
    return
  }
  func.func @transform_0(%arg0: i32) -> (i32, i32, i32) {
    %c0_i32 = arith.constant 0 : i32
    %c0_i32_0 = arith.constant 0 : i32
    %c0_i32_1 = arith.constant 0 : i32
    return %arg0, %c0_i32, %c0_i32_0 : i32, i32, i32
  }
  func.func @transform_1(%arg0: i32) -> (i32, i32) {
    %c0_i32 = arith.constant 0 : i32
    %c0_i32_0 = arith.constant 0 : i32
    %c0_i32_1 = arith.constant 0 : i32
    return %c0_i32, %c0_i32_0 : i32, i32
  }
  func.func @transform_2(%arg0: i32) -> (i32, i32) {
    %c0_i32 = arith.constant 0 : i32
    %c0_i32_0 = arith.constant 0 : i32
    %c0_i32_1 = arith.constant 0 : i32
    return %c0_i32, %c0_i32_0 : i32, i32
  }
  func.func @transform_3(%arg0: i32) -> (i32, i32) {
    %c0_i32 = arith.constant 0 : i32
    %c0_i32_0 = arith.constant 0 : i32
    %c0_i32_1 = arith.constant 0 : i32
    return %c0_i32, %c0_i32_0 : i32, i32
  }
  func.func @transform_4(%arg0: i32) -> (i32, i32) {
    %c0_i32 = arith.constant 0 : i32
    %c0_i32_0 = arith.constant 0 : i32
    %c0_i32_1 = arith.constant 0 : i32
    return %c0_i32, %c0_i32_0 : i32, i32
  }
  func.func @transform_5(%arg0: i32) -> (i32, i32, i32) {
    %c0_i32 = arith.constant 0 : i32
    %c0_i32_0 = arith.constant 0 : i32
    %c0_i32_1 = arith.constant 0 : i32
    return %arg0, %c0_i32, %c0_i32_0 : i32, i32, i32
  }
}

</mosaic_0001>

<bundles_post_ra>
// kernel: dino_with_segmentation.8
= control target key start
LH: loop header
LB: loop body
LE: loop exit
PB: predicated region body
PF: predicated region fallthrough
CT: control target
= control target key end

     0   :  { %s461_s12 = smov 0   ;;  %s527_s0 = inlined_call_operand.vmem [shape: f32[2,16,192], index: 0, kind: input, shape index: {}]   ;;  %s528_s1 = inlined_call_operand.vmem [shape: bf16[192,32], index: 1, kind: input, shape index: {}]   ;;  %s529_s2 = inlined_call_operand.vmem [shape: f32[1,32], index: 2, kind: input, shape index: {}]   ;;  %s530_s3 = inlined_call_operand.vmem [shape: f32[2,16,32], index: 3, kind: output, shape index: {}]  }
   0x1 LB: > { %s384_s13 = sadd.s32 4294967295, %s438_s12   ;;  %p388_p0 = scmp.ge.s32.totalorder %s438_s12, 1  ;;  %s438_s12 = sphi %s461_s12, %s13_s12  }
   0x2   : > { %p137_p1 = scmp.lt.s32.totalorder %s438_s12, 3 }
   0x4   : > { %p138_p2 = pnand %p388_p0, %p137_p1 }
   0x5   : > { %p161_p3 = scmp.lt.s32.totalorder (!%p138_p2), %s384_s13, 1 }
   0x6   : > { %141 = sbr.rel (%p138_p2) target bundleno = 260 (0x104), region = 32 }
   0xb   : > { %v420_v0 = vld [vmem:[%s528_s1 + $0x38] sm:$0xff]   ;;  %v440_v1 = vmov 0   ;;  %v421_v2 = vld [vmem:[%s528_s1 + $0x30] sm:$0xff]   ;;  %s532_s13 = smov (!%p161_p3, %s384_s13), 1  ;;  %v422_v3 = vld [vmem:[%s528_s1 + $0x28] sm:$0xff]   ;;  %vm281_vm0 = vcmask 523264  }
   0xc   : > { %285 = vmatprep.subr.bf16.mxu0 %v440_v1  ;;  %s409_s20 = sshll.u32 %s532_s13, 5  ;;  %v423_v4 = vld [vmem:[%s528_s1 + $0x20] sm:$0xff]   ;;  %v424_v8 = vld [vmem:[%s528_s1 + $0x18] sm:$0xff]   ;;  %v425_v9 = vld [vmem:[%s528_s1 + $0x10] sm:$0xff]   ;;  %s410_s17 = sshll.u32 %s532_s13, 4  ;;  %vm326_vm1 = vcmask 261120  }
   0xd   : > { %286 = vmatpush1.bf16.msra.mxu0 %v420_v0  ;;  %s484_s23 = scalar_lea.vmem %s527_s0, %s409_s20  ;;  %v426_v10 = vld [vmem:[%s528_s1 + $0x8] sm:$0xff]   ;;  %v427_v11 = vld [vmem:[%s528_s1] sm:$0xff]   ;;  %v428_v12 = vld [vmem:[%s528_s1 + $0x58] sm:$0xff]   ;;  %s170_s22 = scalar_lea.vmem %s530_s3, %s410_s17 }
   0xe   : > { %287 = vmatprep.subr.bf16.mxu0 %v440_v1  ;;  %v173_v5 = vld [vmem:[%s484_s23 + $0x8] sm:$0xff]  ;;  %v175_v6 = vld [vmem:[%s484_s23 + $0x18] sm:$0xff]  ;;  %v429_v13 = vld [vmem:[%s528_s1 + $0x50] sm:$0xff]  }
   0xf   : > { %v177_v7 = vpack.c.bf16 %v175_v6, %v173_v5  ;;  %v430_v14 = vld [vmem:[%s528_s1 + $0x48] sm:$0xff]   ;;  %v431_v15 = vld [vmem:[%s528_s1 + $0x40] sm:$0xff]   ;;  %v174_v17 = vld [vmem:[%s484_s23 + $0x10] sm:$0xff] }
  0x10   : > { %v172_v16 = vld [vmem:[%s484_s23] sm:$0xff] }
  0x11   : > { %288 = vmatpush1.bf16.msra.mxu0 %v421_v2  ;;  %406 = vmatprep.mubr.msk.bf16.mxu0 %vm281_vm0, %v177_v7  ;;  %v176_v18 = vpack.c.bf16 %v174_v17, %v172_v16  ;;  %v393_v19 = vld [vmem:[%s529_s2] ss:$0 sm:$0xff] }
  0x12   : > { %289 = vmatprep.subr.bf16.mxu0 %v440_v1 }
  0x15   : > { %290 = vmatpush1.bf16.msra.mxu0 %v422_v3 }
  0x16   : > { %291 = vmatprep.subr.bf16.mxu0 %v440_v1 }
  0x19   : > { %292 = vmatpush1.bf16.msra.mxu0 %v423_v4 }
  0x1a   : > { %293 = vmatprep.subr.bf16.mxu0 %v440_v1 }
  0x1d   : > { %294 = vmatpush1.bf16.msra.mxu0 %v424_v8 }
  0x1e   : > { %295 = vmatprep.subr.bf16.mxu0 %v440_v1 }
  0x21   : > { %296 = vmatpush1.bf16.msra.mxu0 %v425_v9 }
  0x22   : > { %297 = vmatprep.subr.bf16.mxu0 %v440_v1 }
  0x25   : > { %298 = vmatpush1.bf16.msra.mxu0 %v426_v10 }
  0x26   : > { %299 = vmatprep.subr.bf16.mxu0 %v440_v1 }
  0x29   : > { %300 = vmatpush1.bf16.msra.mxu0 %v427_v11 }
  0x2a   : > { %309 = vmatprep.subr.bf16.mxu0 %v440_v1 }
  0x2d   : > { %310 = vmatpush2.bf16.msra.mxu0 %v428_v12 }
  0x2e   : > { %311 = vmatprep.subr.bf16.mxu0 %v440_v1 }
  0x31   : > { %312 = vmatpush2.bf16.msra.mxu0 %v429_v13 }
  0x32   : > { %313 = vmatprep.subr.bf16.mxu0 %v440_v1 }
  0x35   : > { %314 = vmatpush2.bf16.msra.mxu0 %v430_v14 }
  0x36   : > { %315 = vmatprep.subr.bf16.mxu0 %v440_v1 }
  0x39   : > { %316 = vmatpush2.bf16.msra.mxu0 %v431_v15 }
  0x3c   : > { %318 = vmatmul.mubr.bf16.vlgmr.msra.gmra.mxu0 %v176_v18 }
  0xfc   : > { %v319_v20 = vpop.f32.mrf.mxu0 }
  0xfd   : > { %v320_v21 = vadd.f32 %v393_v19, %v319_v20 }
  0xfe   : > { %v321_v22 = vpop.f32.mrf.mxu0 }
  0xff   : > { %327 = vst.msk [vmem:[%s170_s22] sm:$0xff] %vm326_vm1, %v320_v21 }
 0x100   : > { %v322_v23 = vpop.f32.mrf.mxu0 }
 0x101   : > { %v323_v24 = vadd.f32 %v393_v19, %v322_v23 }
 0x102   : > { %v324_v25 = vpop.f32.mrf.mxu0 }
 0x103   : > { %328 = vst.msk [vmem:[%s170_s22 + $0x8] sm:$0xff] %vm326_vm1, %v323_v24 }
 0x104 PF: > { %s13_s12 = sadd.s32 1, %s438_s12  }
 0x105   : > { %p10_p4 = scmp.ge.s32.totalorder %s13_s12, 4  }
 0x107   :  { %12 = sbr.rel (!%p10_p4) target bundleno = 1 (0x1), region = 62 }

// kernel: dino_with_segmentation.9
= control target key start
LH: loop header
LB: loop body
LE: loop exit
PB: predicated region body
PF: predicated region fallthrough
CT: control target
= control target key end

     0   :  { %s537_s18 = smov 0   ;;  %s581_s0 = inlined_call_operand.vmem [shape: f32[2,17,32], index: 0, kind: input, shape index: {}]   ;;  %s582_s1 = inlined_call_operand.vmem [shape: f32[1,32], index: 1, kind: input, shape index: {}]   ;;  %s583_s2 = inlined_call_operand.vmem [shape: f32[1,32], index: 2, kind: input, shape index: {}]   ;;  %s584_s3 = inlined_call_operand.vmem [shape: bf16[32,96], index: 3, kind: input, shape index: {}]   ;;  %s585_s4 = inlined_call_operand.vmem [shape: f32[1,96], index: 4, kind: input, shape index: {}]   ;;  %s586_s5 = inlined_call_operand.vmem [shape: bf16[2,17,96], index: 5, kind: output, shape index: {}]  }
   0x1 LB: > { %s447_s19 = sadd.s32 4294967295, %s505_s18   ;;  %p451_p0 = scmp.ge.s32.totalorder %s505_s18, 1  ;;  %s505_s18 = sphi %s537_s18, %s15_s18  }
   0x2   : > { %p187_p1 = scmp.lt.s32.totalorder %s505_s18, 3 }
   0x4   : > { %p188_p2 = pnand %p451_p0, %p187_p1 }
   0x5   : > { %p215_p3 = scmp.lt.s32.totalorder (!%p188_p2), %s447_s19, 1 }
   0x6   : > { %191 = sbr.rel (%p188_p2) target bundleno = 536 (0x218), region = 40 }
   0xb   : > { %s588_s19 = smov (!%p215_p3, %s447_s19), 1  ;;  %vm229_vm0 = vcmask 261120   ;;  %vm236_vm1 = vcmask 253952   ;;  %v491_v21 = vld [vmem:[%s584_s3 + $0x8] sm:$0xff]   ;;  %v492_v22 = vld [vmem:[%s584_s3] sm:$0xff]   ;;  %vm386_vm2 = vcmask 778240  }
   0xc   : > { %s481_s20 = smul.u32 24, %s588_s19  ;;  %473 = vmatprep.subr.bf16.mxu0 %v491_v21  ;;  %v454_v34 = vld [vmem:[%s582_s1] ss:$0 sm:$0xff]  ;;  %vm387_vm3 = vsmask.f32 256  ;;  %vm383_vm5 = vcmask 781312  }
   0xd   : > { %474 = vmatpush3.bf16.msra.mxu0 %v491_v21  ;;  %v455_v40 = vld [vmem:[%s583_s2] ss:$0 sm:$0xff]  ;;  %s482_s7 = smul.u32 12, %s588_s19  ;;  %vm388_vm4 = vmand %vm386_vm2, %vm387_vm3 }
   0xe   : > { %s219_s23 = scalar_lea.vmem %s581_s0, %s481_s20  ;;  %475 = vmatprep.subr.bf16.mxu0 %v492_v22  ;;  %v456_v48 = vld [vmem:[%s585_s4] ss:$0 sm:$0xff] }
   0xf   : > { %v226_v0 = vld [vmem:[%s219_s23] sm:$0xff]  ;;  %v228_v1 = vld [vmem:[%s219_s23 + $0x10] sm:$0x1]  ;;  %v227_v2 = vld [vmem:[%s219_s23 + $0x8] sm:$0xff]  ;;  %s224_s12 = scalar_lea.vmem %s586_s5, %s482_s7 }
  0x10   : > { %v230_v3 = vsel %vm229_vm0, %v226_v0, 0.0  ;;  %v237_v4 = vsel %vm236_vm1, %v228_v1, 0.0  ;;  %v233_v5 = vsel %vm229_vm0, %v227_v2, 0.0  ;;  %v389_v51 = vld [vmem:[%s224_s12 + $0x8] sm:$0x1] }
  0x11   : > { %231 = vadd.xlane.f32.xlu0 %v230_v3  ;;  %238 = vadd.xlane.f32.xlu1 %v237_v4 }
  0x12   : > { %476 = vmatpush3.bf16.msra.mxu0 %v492_v22 }
  0x15   : > { %234 = vadd.xlane.f32.xlu0 %v233_v5 }
  0x9a   : > { %v232_v6 = vpop.xlane.xlu0 %231  ;;  %v239_v7 = vpop.xlane.xlu1 %238 }
  0x9b   : > { %v241_v8 = vmul.f32 0.03125, %v232_v6  ;;  %v243_v9 = vmul.f32 0.03125, %v239_v7 }
  0x9d   : > { %v244_v10 = vsub.f32 %v226_v0, %v241_v8  ;;  %v246_v11 = vsub.f32 %v228_v1, %v243_v9 }
  0x9e   : > { %v235_v12 = vpop.xlane.xlu0 %234 }
  0x9f   : > { %v242_v13 = vmul.f32 0.03125, %v235_v12  ;;  %v247_v14 = vmul.f32 %v244_v10, %v244_v10  ;;  %v249_v15 = vmul.f32 %v246_v11, %v246_v11 }
  0xa1   : > { %v245_v16 = vsub.f32 %v227_v2, %v242_v13  ;;  %v250_v17 = vsel %vm229_vm0, %v247_v14, 0.0  ;;  %v256_v18 = vsel %vm236_vm1, %v249_v15, 0.0 }
  0xa2   : > { %251 = vadd.xlane.f32.xlu1 %v250_v17 }
  0xa3   : > { %v248_v19 = vmul.f32 %v245_v16, %v245_v16 }
  0xa5   : > { %v253_v20 = vsel %vm229_vm0, %v248_v19, 0.0 }
  0xa6   : > { %257 = vadd.xlane.f32.xlu1 %v256_v18  ;;  %254 = vadd.xlane.f32.xlu0 %v253_v20 }
 0x12b   : > { %v252_v23 = vpop.xlane.xlu1 %251 }
 0x12c   : > { %v259_v24 = vmul.f32 0.03125, %v252_v23 }
 0x12e   : > { %v262_v25 = vadd.f32 1e-06, %v259_v24 }
 0x12f   : > { %v258_v26 = vpop.xlane.xlu1 %257  ;;  %v255_v27 = vpop.xlane.xlu0 %254 }
 0x130   : > { %493 = vrsqrt.f32 %v262_v25  ;;  %v261_v28 = vmul.f32 0.03125, %v258_v26  ;;  %v260_v29 = vmul.f32 0.03125, %v255_v27 }
 0x132   : > { %v264_v30 = vadd.f32 1e-06, %v261_v28  ;;  %v263_v31 = vadd.f32 1e-06, %v260_v29 }
 0x134   : > { %495 = vrsqrt.f32 %v264_v30 }
 0x135   : > { %497 = vrsqrt.f32 %v263_v31 }
 0x13d   : > { %v494_v32 = vpop.eup %493 }
 0x13e   : > { %v268_v33 = vmul.f32 %v494_v32, %v244_v10 }
 0x140   : > { %v278_v39 = vmul.f32 %v454_v34, %v268_v33 }
 0x141   : > { %v496_v35 = vpop.eup %495 }
 0x142   : > { %v498_v36 = vpop.eup %497  ;;  %v270_v37 = vmul.f32 %v496_v35, %v246_v11  ;;  %v288_v44 = vadd.f32 %v455_v40, %v278_v39 }
 0x143   : > { %v269_v38 = vmul.f32 %v498_v36, %v245_v16 }
 0x144   : > { %v280_v41 = vmul.f32 %v454_v34, %v270_v37 }
 0x145   : > { %v279_v42 = vmul.f32 %v454_v34, %v269_v38 }
 0x146   : > { %v290_v43 = vadd.f32 %v455_v40, %v280_v41 }
 0x147   : > { %v289_v45 = vadd.f32 %v455_v40, %v279_v42 }
 0x148   : > { %v292_v46 = vpack.c.bf16 %v290_v43, %v290_v43 }
 0x149   : > { %v291_v47 = vpack.c.bf16 %v289_v45, %v288_v44 }
 0x14b   : > { %477 = vmatprep.mubr.msk.bf16.mxu0 %vm229_vm0, %v291_v47 }
 0x14c   : > { %478 = vmatmul.mubr.msk.bf16.vlgmr.msra.gmra.mxu0 %vm229_vm0, %v292_v46 }
 0x20c   : > { %v479_v49 = vpop.f32.mrf.mxu0 }
 0x20d   : > { %v365_v50 = vadd.f32 %v479_v49, %v456_v48 }
 0x20e   : > { %v356_v52 = vpop.f32.mrf.mxu0 }
 0x20f   : > { %v468_v53 = vpack.c.bf16 %v365_v50, %v365_v50  ;;  %v357_v54 = vadd.f32 %v456_v48, %v356_v52 }
 0x210   : > { %v480_v55 = vpop.f32.mrf.mxu0 }
 0x211   : > { %v390_v56 = vsel %vm388_vm4, %v468_v53, %v389_v51  ;;  %v466_v57 = vpack.c.bf16 %v357_v54, %v357_v54 }
 0x212   : > { %391 = vst [vmem:[%s224_s12 + $0x8] sm:$0x1] %v390_v56  ;;  %v359_v58 = vpop.f32.mrf.mxu0 }
 0x213   : > { %384 = vst.msk [vmem:[%s224_s12] sm:$0xf] %vm383_vm5, %v466_v57  ;;  %v360_v59 = vadd.f32 %v456_v48, %v359_v58 }
 0x215   : > { %v467_v60 = vpack.c.bf16 %v360_v59, %v360_v59 }
 0x217   : > { %385 = vst.msk [vmem:[%s224_s12 + $0x4] sm:$0xf] %vm383_vm5, %v467_v60 }
 0x218 PF: > { %s15_s18 = sadd.s32 1, %s505_s18  }
 0x219   : > { %p12_p4 = scmp.ge.s32.totalorder %s15_s18, 4  }
 0x21b   :  { %14 = sbr.rel (!%p12_p4) target bundleno = 1 (0x1), region = 70 }

// kernel: dino_with_segmentation.10
= control target key start
LH: loop header
LB: loop body
LE: loop exit
PB: predicated region body
PF: predicated region fallthrough
CT: control target
= control target key end

     0   :  { %s967_s15 = smov 0   ;;  %s1048_s0 = inlined_call_operand.vmem [shape: bf16[2,17,96], index: 0, kind: input, shape index: {}]   ;;  %s1049_s1 = inlined_call_operand.vmem [shape: bf16[32,32], index: 1, kind: input, shape index: {}]   ;;  %s1050_s2 = inlined_call_operand.vmem [shape: f32[1,32], index: 2, kind: input, shape index: {}]   ;;  %s1051_s3 = inlined_call_operand.vmem [shape: f32[2,17,32], index: 3, kind: input, shape index: {}]   ;;  %s1052_s4 = inlined_call_operand.vmem [shape: f32[2,17,32], index: 4, kind: output, shape index: {}]  }
   0x1 LB: > { %s787_s16 = sadd.s32 4294967295, %s934_s15   ;;  %p791_p0 = scmp.ge.s32.totalorder %s934_s15, 1  ;;  %s934_s15 = sphi %s967_s15, %s14_s15  }
   0x2   : > { %p172_p1 = scmp.lt.s32.totalorder %s934_s15, 3 }
   0x4   : > { %p173_p2 = pnand %p791_p0, %p172_p1 }
   0x5   : > { %p203_p3 = scmp.lt.s32.totalorder (!%p173_p2), %s787_s16, 1  ;;  %s936_s21 = smov (!%p173_p2), 96  }
   0x6   : > { %176 = sbr.rel (%p173_p2) target bundleno = 1126 (0x466), region = 36  ;;  %s937_s22 = smov (!%p173_p2), 80  }
   0x7   : > { %s938_s23 = smov (!%p173_p2), 112   ;;  %s939_s24 = smov (!%p173_p2), 64  }
   0x8   : > { %s941_s25 = smov (!%p173_p2), 48  }
   0xb   : > { %s1054_s16 = smov (!%p203_p3, %s787_s16), 1  ;;  %vm247_vm0 = vcmask 130048   ;;  %vm318_vm1 = vcmask 131072   ;;  %vm311_vm2 = vcmask 138240   ;;  %vm353_vm3 = vcmask 1040384  }
   0xc   : > { %s884_s17 = smul.u32 12, %s1054_s16  ;;  %v940_v38 = vmov 0   ;;  %vm718_vm4 = vcmask 253952   ;;  %vm715_vm5 = vcmask 261120  }
   0xd   : > { %v355_v39 = vsel %vm353_vm3, 65535, %v940_v38  ;;  %s885_s30 = smul.u32 24, %s1054_s16 }
   0xe   : > { %s207_s20 = scalar_lea.vmem %s1048_s0, %s884_s17 }
   0xf   : > { %v981_v0 = vld [vmem:[%s207_s20 + $0x8] ss:$0 sps:$4 sm:$0x11]   ;;  %v983_v1 = vld [vmem:[%s207_s20] sm:$0xff]   ;;  %s212_s7 = scalar_lea.vmem %s1051_s3, %s885_s30  ;;  %s217_s12 = scalar_lea.vmem %s1052_s4, %s885_s30 }
  0x10   : > { %245 = vrot.lane.b32.xlu0 %v981_v0, %s936_s21  ;;  %486 = vrot.lane.b32.xlu1 %v981_v0, %s937_s22 }
  0x11   : > { %840 = vmatprep.mubr.msk.bf16.mxu0 %vm247_vm0, %v983_v1 }
  0x14   : > { %243 = vrot.lane.b32.xlu0 %v983_v1, %s936_s21  ;;  %484 = vrot.lane.b32.xlu1 %v983_v1, %s937_s22 }
  0x18   : > { %480 = vrot.lane.b32.xlu0 %v983_v1, %s938_s23  ;;  %482 = vrot.lane.b32.xlu1 %v981_v0, %s938_s23 }
  0x82   : > { %v246_v2 = vpop.permute.xlu0 %245  ;;  %v487_v6 = vpop.permute.xlu1 %486 }
  0x83   : > { %880 = vmatprep.subr.msk.bf16.mxu0 %vm247_vm0, %v246_v2  ;;  %v258_v3 = vsel %vm247_vm0, %v246_v2, 0  ;;  %v498_v7 = vsel %vm247_vm0, %v487_v6, 0 }
  0x84   : > { %837 = vmatpush3.bf16.xpose.msra.mxu0 %v258_v3 }
  0x86   : > { %v244_v4 = vpop.permute.xlu0 %243  ;;  %v485_v9 = vpop.permute.xlu1 %484 }
  0x87   : > { %881 = vmatprep.subr.msk.bf16.mxu0 %vm247_vm0, %v244_v4  ;;  %v255_v5 = vsel %vm247_vm0, %v244_v4, 0  ;;  %v495_v10 = vsel %vm247_vm0, %v485_v9, 0 }
  0x8a   : > { %v481_v8 = vpop.permute.xlu0 %480  ;;  %v483_v11 = vpop.permute.xlu1 %482 }
  0x8c   : > { %839 = vmatpush3.bf16.xpose.msra.mxu0 %v255_v5 }
  0x8d   : > { %882 = vmatprep.subr.msk.bf16.mxu0 %vm247_vm0, %v487_v6  ;;  %v902_v6 = vld [vmem:[%s1049_s1] sm:$0xff]  }
  0x93   : > { %841 = vmatmul.mubr.msk.bf16.vlgmr.msra.gmra.mxu0 %vm247_vm0, %v981_v0 }
  0x94   : > { %859 = vmatpush3.bf16.xpose.msra.mxu0 %v498_v7  ;;  %862 = vmatprep.mubr.msk.bf16.mxu0 %vm247_vm0, %v481_v8 }
  0x95   : > { %883 = vmatprep.subr.msk.bf16.mxu0 %vm247_vm0, %v485_v9 }
  0x9c   : > { %861 = vmatpush3.bf16.xpose.msra.mxu0 %v495_v10 }
  0xa3   : > { %863 = vmatmul.mubr.msk.bf16.vlgmr.msra.gmra.mxu0 %vm247_vm0, %v483_v11 }
 0x153   : > { %v842_v12 = vpop.f32.mrf.mxu0 }
 0x154   : > { %v310_v13 = vmul.f32 0.25, %v842_v12 }
 0x155   : > { %v294_v14 = vpop.f32.mrf.mxu0 }
 0x156   : > { %v308_v15 = vmul.f32 0.25, %v294_v14  ;;  %v319_v16 = vsel %vm318_vm1, %v310_v13, -inf }
 0x157   : > { %320 = vmax.xlane.f32.xlu0 %v319_v16  ;;  %v843_v17 = vpop.f32.mrf.mxu0 }
 0x158   : > { %v312_v20 = vsel %vm311_vm2, %v308_v15, -inf }
 0x159   : > { %v297_v18 = vpop.f32.mrf.mxu0 }
 0x15a   : > { %v309_v19 = vmul.f32 0.25, %v297_v18 }
 0x15b   : > { %313 = vmax.xlane.f32.xlu0 %v312_v20 }
 0x15c   : > { %v315_v21 = vsel %vm311_vm2, %v309_v19, -inf }
 0x15d   : > { %316 = vmax.xlane.f32.xlu1 %v315_v21 }
 0x163   : > { %v864_v22 = vpop.f32.mrf.mxu0 }
 0x164   : > { %v550_v27 = vmul.f32 0.25, %v864_v22 }
 0x165   : > { %v534_v23 = vpop.f32.mrf.mxu0 }
 0x166   : > { %v548_v29 = vmul.f32 0.25, %v534_v23  ;;  %v557_v30 = vsel %vm318_vm1, %v550_v27, -inf }
 0x167   : > { %v865_v24 = vpop.f32.mrf.mxu0 }
 0x168   : > { %v551_v31 = vsel %vm311_vm2, %v548_v29, -inf }
 0x169   : > { %v537_v25 = vpop.f32.mrf.mxu0 }
 0x16a   : > { %v549_v26 = vmul.f32 0.25, %v537_v25 }
 0x16c   : > { %v554_v28 = vsel %vm311_vm2, %v549_v26, -inf }
 0x16e   : > { %342 = vrot.lane.b32.xlu1 %v983_v1, %s939_s24 }
 0x171   : > { %344 = vrot.lane.b32.xlu0 %v981_v0, %s939_s24 }
 0x190   : > { %555 = vmax.xlane.f32.xlu0 %v554_v28 }
 0x192   : > { %558 = vmax.xlane.f32.xlu1 %v557_v30 }
 0x196   : > { %552 = vmax.xlane.f32.xlu1 %v551_v31 }
 0x1e0   : > { %v321_v32 = vpop.xlane.xlu0 %320 }
 0x1e1   : > { %v324_v33 = vsub.f32 %v310_v13, %v321_v32 }
 0x1e3   : > { %v329_v34 = vmul.f32 1.442695, %v324_v33 }
 0x1e4   : > { %v314_v35 = vpop.xlane.xlu0 %313 }
 0x1e5   : > { %904 = vpow2.f32 %v329_v34  ;;  %v322_v36 = vsub.f32 %v308_v15, %v314_v35 }
 0x1e6   : > { %v317_v37 = vpop.xlane.xlu1 %316 }
 0x1e7   : > { %v325_v40 = vmul.f32 1.442695, %v322_v36  ;;  %v323_v41 = vsub.f32 %v309_v19, %v317_v37 }
 0x1e8   : > { %v345_v42 = vpop.permute.xlu0 %344 }
 0x1e9   : > { %906 = vpow2.f32 %v325_v40  ;;  %v327_v43 = vmul.f32 1.442695, %v323_v41  ;;  %v357_v44 = vand.u32 %v355_v39, %v345_v42 }
 0x1ea   : > { %v343_v45 = vpop.permute.xlu1 %342 }
 0x1eb   : > { %908 = vpow2.f32 %v327_v43  ;;  %844 = vmatprep.subr.bf16.mxu1 %v357_v44 }
 0x1ec   : > { %845 = vmatpush3.bf16.msra.mxu1 %v357_v44 }
 0x1ed   : > { %846 = vmatprep.subr.bf16.mxu1 %v343_v45 }
 0x1f0   : > { %847 = vmatpush3.bf16.msra.mxu1 %v343_v45 }
 0x1f1   : > { %852 = vmatprep.subr.bf16.mxu1 %v902_v6 }
 0x1f2   : > { %v905_v46 = vpop.eup %904 }
 0x1f3   : > { %v337_v47 = vsel %vm318_vm1, %v905_v46, 0.0  ;;  %v341_v53 = vpack.c.bf16 %v905_v46, %v905_v46  ;;  %v224_v46 = vld [vmem:[%s212_s7 + $0x10] sm:$0x1] }
 0x1f4   : > { %338 = vadd.xlane.f32.xlu0 %v337_v47  ;;  %v795_v47 = vld [vmem:[%s1050_s2] ss:$0 sm:$0xff] }
 0x1f6   : > { %v907_v48 = vpop.eup %906 }
 0x1f7   : > { %v331_v49 = vsel %vm311_vm2, %v907_v48, 0.0 }
 0x1f8   : > { %v909_v50 = vpop.eup %908  ;;  %332 = vadd.xlane.f32.xlu1 %v331_v49  ;;  %v234_v49 = vadd.f32 %v795_v47, %v224_v46 }
 0x1f9   : > { %v334_v51 = vsel %vm311_vm2, %v909_v50, 0.0  ;;  %v340_v52 = vpack.c.bf16 %v909_v50, %v907_v48  ;;  %v222_v48 = vld [vmem:[%s212_s7] sm:$0xff] }
 0x1fa   : > { %335 = vadd.xlane.f32.xlu0 %v334_v51  ;;  %v232_v50 = vadd.f32 %v795_v47, %v222_v48  ;;  %v223_v51 = vld [vmem:[%s212_s7 + $0x8] sm:$0xff] }
 0x1fb   : > { %848 = vmatprep.mubr.msk.bf16.mxu1 %vm311_vm2, %v340_v52 }
 0x1fc   : > { %849 = vmatmul.mubr.msk.bf16.vlgmr.msra.gmra.mxu1 %vm311_vm2, %v341_v53 }
 0x1fd   : > { %853 = vmatpush3.bf16.msra.mxu1 %v902_v6 }
 0x209   : > { %580 = vrot.lane.b32.xlu1 %v983_v1, %s941_s25 }
 0x210   : > { %582 = vrot.lane.b32.xlu0 %v981_v0, %s941_s25 }
 0x219   : > { %v556_v54 = vpop.xlane.xlu0 %555 }
 0x21a   : > { %v561_v55 = vsub.f32 %v549_v26, %v556_v54  ;;  %v903_v26 = vld [vmem:[%s1049_s1 + $0x8] sm:$0xff]  }
 0x21b   : > { %v559_v56 = vpop.xlane.xlu1 %558 }
 0x21c   : > { %v565_v57 = vmul.f32 1.442695, %v561_v55  ;;  %v562_v58 = vsub.f32 %v550_v27, %v559_v56  ;;  %v233_v55 = vadd.f32 %v795_v47, %v223_v51 }
 0x21e   : > { %910 = vpow2.f32 %v565_v57  ;;  %v567_v59 = vmul.f32 1.442695, %v562_v58 }
 0x21f   : > { %v553_v60 = vpop.xlane.xlu1 %552 }
 0x220   : > { %v560_v61 = vsub.f32 %v548_v29, %v553_v60  ;;  %912 = vpow2.f32 %v567_v59 }
 0x222   : > { %v563_v62 = vmul.f32 1.442695, %v560_v61 }
 0x224   : > { %914 = vpow2.f32 %v563_v62 }
 0x22b   : > { %v911_v63 = vpop.eup %910 }
 0x22c   : > { %v572_v2 = vsel %vm311_vm2, %v911_v63, 0.0 }
 0x22d   : > { %v913_v3 = vpop.eup %912 }
 0x22e   : > { %v575_v0 = vsel %vm318_vm1, %v913_v3, 0.0  ;;  %v579_v25 = vpack.c.bf16 %v913_v3, %v913_v3 }
 0x22f   : > { %573 = vadd.xlane.f32.xlu0 %v572_v2 }
 0x231   : > { %v915_v1 = vpop.eup %914 }
 0x232   : > { %v569_v4 = vsel %vm311_vm2, %v915_v1, 0.0  ;;  %v578_v5 = vpack.c.bf16 %v911_v63, %v915_v1 }
 0x233   : > { %576 = vadd.xlane.f32.xlu0 %v575_v0  ;;  %570 = vadd.xlane.f32.xlu1 %v569_v4 }
 0x27d   : > { %v339_v7 = vpop.xlane.xlu0 %338 }
 0x27e   : > { %916 = vrcp.f32 %v339_v7 }
 0x281   : > { %v333_v11 = vpop.xlane.xlu1 %332 }
 0x282   : > { %918 = vrcp.f32 %v333_v11 }
 0x283   : > { %v336_v8 = vpop.xlane.xlu0 %335 }
 0x284   : > { %920 = vrcp.f32 %v336_v8 }
 0x285   : > { %v581_v24 = vpop.permute.xlu1 %580 }
 0x287   : > { %v583_v9 = vpop.permute.xlu0 %582 }
 0x288   : > { %v592_v10 = vand.u32 %v583_v9, %v355_v39 }
 0x28a   : > { %866 = vmatprep.subr.bf16.mxu1 %v592_v10 }
 0x28b   : > { %v917_v14 = vpop.eup %916 }
 0x28f   : > { %v919_v16 = vpop.eup %918 }
 0x291   : > { %v921_v17 = vpop.eup %920 }
 0x2b8   : > { %v574_v27 = vpop.xlane.xlu0 %573 }
 0x2b9   : > { %922 = vrcp.f32 %v574_v27 }
 0x2bc   : > { %v850_v12 = vpop.f32.mrf.mxu1  ;;  %v577_v28 = vpop.xlane.xlu0 %576 }
 0x2bd   : > { %v412_v18 = vmul.f32 %v917_v14, %v850_v12  ;;  %v571_v29 = vpop.xlane.xlu1 %570  ;;  %924 = vrcp.f32 %v577_v28 }
 0x2be   : > { %v393_v13 = vpop.f32.mrf.mxu1  ;;  %926 = vrcp.f32 %v571_v29 }
 0x2bf   : > { %v410_v20 = vmul.f32 %v919_v16, %v393_v13  ;;  %v414_v23 = vpack.c.bf16 %v412_v18, %v412_v18 }
 0x2c0   : > { %v851_v15 = vpop.f32.mrf.mxu1 }
 0x2c2   : > { %v396_v19 = vpop.f32.mrf.mxu1 }
 0x2c3   : > { %v411_v21 = vmul.f32 %v921_v17, %v396_v19 }
 0x2c5   : > { %v413_v22 = vpack.c.bf16 %v411_v21, %v410_v20 }
 0x2c6   : > { %v923_v36 = vpop.eup %922 }
 0x2c7   : > { %854 = vmatprep.mubr.msk.bf16.mxu1 %vm247_vm0, %v413_v22 }
 0x2c8   : > { %855 = vmatmul.mubr.msk.bf16.vlgmr.msra.gmra.mxu1 %vm247_vm0, %v414_v23 }
 0x2c9   : > { %867 = vmatpush3.bf16.msra.mxu1 %v592_v10  ;;  %870 = vmatprep.mubr.msk.bf16.mxu1 %vm311_vm2, %v578_v5 }
 0x2ca   : > { %868 = vmatprep.subr.bf16.mxu1 %v581_v24  ;;  %v925_v38 = vpop.eup %924 }
 0x2cb   : > { %v927_v39 = vpop.eup %926 }
 0x2cd   : > { %869 = vmatpush3.bf16.msra.mxu1 %v581_v24 }
 0x2ce   : > { %874 = vmatprep.subr.bf16.mxu1 %v903_v26 }
 0x2d0   : > { %871 = vmatmul.mubr.msk.bf16.vlgmr.msra.gmra.mxu1 %vm311_vm2, %v579_v25 }
 0x2d1   : > { %875 = vmatpush3.bf16.msra.mxu1 %v903_v26 }
 0x388   : > { %v856_v30 = vpop.f32.mrf.mxu1 }
 0x389   : > { %v479_v52 = vadd.f32 %v856_v30, %v234_v49 }
 0x38a   : > { %v463_v31 = vpop.f32.mrf.mxu1 }
 0x38b   : > { %v477_v54 = vadd.f32 %v463_v31, %v232_v50 }
 0x38c   : > { %v857_v32 = vpop.f32.mrf.mxu1 }
 0x38e   : > { %v466_v33 = vpop.f32.mrf.mxu1 }
 0x38f   : > { %v478_v60 = vadd.f32 %v466_v33, %v233_v55 }
 0x390   : > { %v872_v34 = vpop.f32.mrf.mxu1 }
 0x391   : > { %v647_v40 = vmul.f32 %v925_v38, %v872_v34 }
 0x392   : > { %v628_v35 = vpop.f32.mrf.mxu1 }
 0x393   : > { %v645_v42 = vmul.f32 %v927_v39, %v628_v35  ;;  %v649_v45 = vpack.c.bf16 %v647_v40, %v647_v40 }
 0x394   : > { %v873_v37 = vpop.f32.mrf.mxu1 }
 0x396   : > { %v631_v41 = vpop.f32.mrf.mxu1 }
 0x397   : > { %v646_v43 = vmul.f32 %v923_v36, %v631_v41 }
 0x399   : > { %v648_v44 = vpack.c.bf16 %v646_v43, %v645_v42 }
 0x39b   : > { %876 = vmatprep.mubr.msk.bf16.mxu1 %vm247_vm0, %v648_v44 }
 0x39c   : > { %877 = vmatmul.mubr.msk.bf16.vlgmr.msra.gmra.mxu1 %vm247_vm0, %v649_v45 }
 0x45c   : > { %v878_v53 = vpop.f32.mrf.mxu1 }
 0x45d   : > { %v714_v56 = vadd.f32 %v878_v53, %v479_v52 }
 0x45e   : > { %v698_v57 = vpop.f32.mrf.mxu1 }
 0x45f   : > { %719 = vst.msk [vmem:[%s217_s12 + $0x10] sm:$0x1] %vm718_vm4, %v714_v56  ;;  %v712_v58 = vadd.f32 %v698_v57, %v477_v54 }
 0x460   : > { %v879_v59 = vpop.f32.mrf.mxu1 }
 0x461   : > { %716 = vst.msk [vmem:[%s217_s12] sm:$0xff] %vm715_vm5, %v712_v58 }
 0x462   : > { %v701_v61 = vpop.f32.mrf.mxu1 }
 0x463   : > { %v713_v62 = vadd.f32 %v701_v61, %v478_v60 }
 0x465   : > { %717 = vst.msk [vmem:[%s217_s12 + $0x8] sm:$0xff] %vm715_vm5, %v713_v62 }
 0x466 PF: > { %s14_s15 = sadd.s32 1, %s934_s15  }
 0x467   : > { %p11_p4 = scmp.ge.s32.totalorder %s14_s15, 4  }
 0x469   :  { %13 = sbr.rel (!%p11_p4) target bundleno = 1 (0x1), region = 69 }

// kernel: dino_with_segmentation.15
= control target key start
LH: loop header
LB: loop body
LE: loop exit
PB: predicated region body
PF: predicated region fallthrough
CT: control target
= control target key end

     0   :  { %10 = vsyncpa [#allocation3], 0  ;;  %s717_s0 = inlined_call_operand.vmem [shape: f32[2,16,32], index: 0, kind: input, shape index: {}]   ;;  %s718_s1 = inlined_call_operand.vmem [shape: f32[1,32], index: 1, kind: input, shape index: {}]   ;;  %s719_s2 = inlined_call_operand.vmem [shape: f32[1,32], index: 2, kind: input, shape index: {}]   ;;  %s720_s3 = inlined_call_operand.vmem [shape: bf16[32,128], index: 3, kind: input, shape index: {}]   ;;  %s721_s4 = inlined_call_operand.vmem [shape: f32[1,128], index: 4, kind: input, shape index: {}]   ;;  %s722_s5 = inlined_call_operand.hbm [shape: f32[2,16,128], index: 5, kind: output, shape index: {}]  }
   0x1   :  { %12 = vsyncpa [#allocation3 + $0x1], 0  ;;  %s595_s18 = smov 0   ;;  %s597_s19 = smov 0  }
   0x2   :  { %s599_s20 = smov 0   ;;  %s601_s21 = smov 0  }
   0x3 LB: > { %s616_s22 = sadd.s32 4294967295, %s558_s21   ;;  %s418_s23 = sadd.s32 4294967294, %s558_s21   ;;  %s558_s21 = sphi %s601_s21, %s728_s21   ;;  %s554_s20 = sphi %s599_s20, %s727_s20   ;;  %s550_s19 = sphi %s597_s19, %s726_s19   ;;  %s546_s18 = sphi %s595_s18, %s725_s18  }
   0x4   : > { %s620_s24 = sadd.s32 1, %s558_s21   ;;  %s135_s25 = sadd.s32 1, %s554_s20 }
   0x5   : > { %s132_s26 = ssub.s32 %s558_s21, %s620_s24  ;;  %p145_p0 = scmp.ne.s32.totalorder %s554_s20, %s550_s19 }
   0x6   : > { %p133_p1 = scmp.eq.s32.totalorder %s132_s26, 0  ;;  %p146_p2 = scmp.eq.s32.totalorder %s616_s22, 1 }
   0x7   : > { %p151_p3 = scmp.ne.s32.totalorder %s550_s19, %s546_s18  ;;  %p152_p4 = scmp.eq.s32.totalorder %s418_s23, 1 }
   0x8   : > { %s631_s27 = scalar_select %p133_p1, %s554_s20, %s135_s25  }
   0x9   : > { %p633_p5 = por %p146_p2, %p145_p0  ;;  %p637_p6 = por %p152_p4, %p151_p3 }
   0xa   : > { %p421_p7 = scmp.ge.s32.totalorder %s558_s21, 1  ;;  %p190_p8 = scmp.lt.s32.totalorder %s558_s21, 3 }
   0xc   : > { %p191_p9 = pnand %p421_p7, %p190_p8 }
   0xd   : > { %p218_p10 = scmp.lt.s32.totalorder (!%p191_p9), %s616_s22, 1  ;;  %s215_s23 = sand.u32 (!%p191_p9), 1, %s550_s19  }
   0xe   : > { %194 = sbr.rel (%p191_p9) target bundleno = 551 (0x227), region = 40  ;;  %s422_s25 = sshll.u32 (!%p191_p9), %s215_s23, 4 }
   0xf   : > { %s437_s8 = sshll.u32 (!%p191_p9), %s616_s22, 8  ;;  %s677_s12 = scalar_lea.sflag (!%p191_p9), [#allocation3], %s215_s23 }
  0x10   : > { %s675_s11 = scalar_lea.hbm (!%p191_p9), %s722_s5, %s437_s8 }
  0x13   : > { %s219_s30 = scalar_select %p218_p10, %s616_s22, 1  ;;  %vm226_vm0 = vcmask 261120   ;;  %v492_v14 = vld [vmem:[%s720_s3 + $0x8] sm:$0xff]   ;;  %v560_v15 = vmov 0.0   ;;  %vm561_vm1 = vmmov 0   ;;  %v493_v16 = vld [vmem:[%s720_s3] sm:$0xff]  }
  0x14   : > { %441 = vmatprep.subr.bf16.mxu0 %v560_v15  ;;  %445 = vmatprep.mubr.msk.bf16.mxu0 %vm561_vm1, %v560_v15  ;;  %v425_v25 = vld [vmem:[%s718_s1] ss:$0 sm:$0xff]  ;;  %s562_s22 = smov [#allocation2]  }
  0x15   : > { %s436_s6 = sshll.u32 %s219_s30, 4  ;;  %442 = vmatpush3.bf16.msra.mxu0 %v492_v14  ;;  %v426_v29 = vld [vmem:[%s719_s2] ss:$0 sm:$0xff]  ;;  %s502_s14 = sshll.u32 %s562_s22, 4  ;;  %s503_s14 = int_to_ptr.vmem [resolvable:$false] %s502_s14 }
  0x16   : > { %s222_s9 = scalar_lea.vmem %s717_s0, %s436_s6  ;;  %443 = vmatprep.subr.bf16.mxu0 %v560_v15  ;;  %v427_v34 = vld [vmem:[%s721_s4] ss:$0 sm:$0xff]  ;;  %s217_s6 = scalar_lea.vmem [#allocation2], %s422_s25 }
  0x17   : > { %v224_v0 = vld [vmem:[%s222_s9] sm:$0xff]  ;;  %v225_v1 = vld [vmem:[%s222_s9 + $0x8] sm:$0xff]  ;;  %s356_s7 = sshll.u32 %s217_s6, 4  ;;  %s504_s15 = scalar_lea.vmem %s503_s14, 512  ;;  %s670_s7 = int_to_ptr.vmem [resolvable:$true] %s356_s7 }
  0x18   : > { %v227_v2 = vsel %vm226_vm0, %v224_v0, 0.0  ;;  %v230_v3 = vsel %vm226_vm0, %v225_v1, 0.0  ;;  %s498_s13 = scalar_lea.vmem %s670_s7, 256  ;;  %p505_p0 = scmp.lt.s32.totalorder %s670_s7, %s503_s14 }
  0x19   : > { %228 = vadd.xlane.f32.xlu0 %v227_v2  ;;  %444 = vmatpush3.bf16.msra.mxu0 %v493_v16  ;;  %p499_p11 = scmp.ne.s32.totalorder %s670_s7, %s498_s13  ;;  %p506_p1 = scmp.lt.s32.totalorder %s504_s15, %s498_s13 }
  0x1b   : > { %p500_p12 = pnand %p499_p11, %p633_p5  ;;  %p507_p2 = por %p506_p1, %p505_p0 }
  0x1d   : > { %231 = vadd.xlane.f32.xlu0 %v230_v3  ;;  %p501_p13 = pneg %p500_p12 }
  0x1f   : > { %p508_p3 = pnand %p507_p2, %p501_p13 }
  0xa2   : > { %v229_v4 = vpop.xlane.xlu0 %228 }
  0xa3   : > { %v234_v5 = vmul.f32 0.03125, %v229_v4 }
  0xa5   : > { %v236_v6 = vsub.f32 %v224_v0, %v234_v5 }
  0xa6   : > { %v232_v7 = vpop.xlane.xlu0 %231 }
  0xa7   : > { %v235_v8 = vmul.f32 0.03125, %v232_v7  ;;  %v238_v9 = vmul.f32 %v236_v6, %v236_v6 }
  0xa9   : > { %v237_v10 = vsub.f32 %v225_v1, %v235_v8  ;;  %v240_v11 = vsel %vm226_vm0, %v238_v9, 0.0 }
  0xaa   : > { %241 = vadd.xlane.f32.xlu1 %v240_v11 }
  0xab   : > { %v239_v12 = vmul.f32 %v237_v10, %v237_v10 }
  0xad   : > { %v243_v13 = vsel %vm226_vm0, %v239_v12, 0.0 }
  0xae   : > { %244 = vadd.xlane.f32.xlu1 %v243_v13 }
 0x133   : > { %v242_v17 = vpop.xlane.xlu1 %241 }
 0x134   : > { %v246_v18 = vmul.f32 0.03125, %v242_v17 }
 0x136   : > { %v248_v19 = vadd.f32 1e-06, %v246_v18 }
 0x137   : > { %v245_v20 = vpop.xlane.xlu1 %244 }
 0x138   : > { %494 = vrsqrt.f32 %v248_v19  ;;  %v247_v21 = vmul.f32 0.03125, %v245_v20 }
 0x13a   : > { %v249_v22 = vadd.f32 1e-06, %v247_v21 }
 0x13c   : > { %496 = vrsqrt.f32 %v249_v22 }
 0x145   : > { %v495_v23 = vpop.eup %494 }
 0x146   : > { %v252_v24 = vmul.f32 %v495_v23, %v236_v6 }
 0x148   : > { %v261_v28 = vmul.f32 %v425_v25, %v252_v24 }
 0x149   : > { %v497_v26 = vpop.eup %496 }
 0x14a   : > { %v253_v27 = vmul.f32 %v497_v26, %v237_v10  ;;  %v270_v31 = vadd.f32 %v426_v29, %v261_v28 }
 0x14c   : > { %v262_v30 = vmul.f32 %v425_v25, %v253_v27 }
 0x14e   : > { %v271_v32 = vadd.f32 %v426_v29, %v262_v30 }
 0x150   : > { %v272_v33 = vpack.c.bf16 %v271_v32, %v270_v31 }
 0x152   : > { %446 = vmatmul.mubr.msk.bf16.vlgmr.msra.gmra.mxu0 %vm226_vm0, %v272_v33 }
 0x212   : > { %v333_v35 = vpop.f32.mrf.mxu0 }
 0x213   : > { %v334_v36 = vadd.f32 %v427_v34, %v333_v35 }
 0x214   : > { %v447_v37 = vpop.f32.mrf.mxu0 }
 0x215   : > { %340 = vst [vmem:[%s217_s6] sm:$0xff] %v334_v36 }
 0x216   : > { %v336_v38 = vpop.f32.mrf.mxu0 }
 0x217   : > { %v337_v39 = vadd.f32 %v427_v34, %v336_v38 }
 0x218   : > { %v448_v40 = vpop.f32.mrf.mxu0 }
 0x219   : > { %341 = vst [vmem:[%s217_s6 + $0x8] sm:$0xff] %v337_v39 }
 0x21a   : > { %511 = shalt.err (!%p508_p3)
}
 0x21b   : > { %s512_s16 = scalar_lea.hbm %s675_s11, 256  ;;  %s516_s25 = scalar_lea.hbm %s722_s5, 512 }
 0x21c   : > { %p513_p4 = scmp.ne.s32.totalorder %s675_s11, %s512_s16  ;;  %p517_p9 = scmp.lt.s32.totalorder %s675_s11, %s722_s5 }
 0x21d   : > { %p518_p10 = scmp.lt.s32.totalorder %s516_s25, %s512_s16 }
 0x21e   : > { %p514_p7 = pnand %p513_p4, %p633_p5 }
 0x21f   : > { %p519_p11 = por %p518_p10, %p517_p9 }
 0x220   : > { %p515_p8 = pneg %p514_p7 }
 0x222   : > { %p520_p12 = pnand %p519_p11, %p515_p8 }
 0x224   : > { %523 = shalt.err (!%p520_p12)
}
 0x225   : > { %s563_s6 = smov 128   ;;  %s564_s8 = smov 8  }
 0x226   : > { %449 = dma.vmem_to_hbm [thread:$0]  (%p633_p5), %s670_s7, 256, %s675_s11, %s677_s12, %s563_s6, %s563_s6, %s564_s8  }
 0x227 PF: > { %p455_p13 = scmp.ge.s32.totalorder %s558_s21, 2  ;;  %s371_s9 = sand.u32 1, %s546_s18  }
 0x228   : > { %s372_s10 = scalar_lea.sflag [#allocation3], %s371_s9 }
 0x229   : > { %p452_p0 = pnand %p455_p13, %p637_p6 }
 0x22b   : > { %p453_p1 = pneg %p452_p0 }
 0x22d   : > { %541 = dma.done.wait (%p453_p1), %s372_s10, 256  }
 0x22e   : > { %543 = vsyncadd (%p453_p1), %s372_s10, 4294967040  ;;  %p15_p2 = scmp.ge.s32.totalorder %s620_s24, 4   ;;  %s725_s18 = smov %s550_s19 }
 0x22f   : > { %s726_s19 = smov %s554_s20  ;;  %s727_s20 = smov %s631_s27 }
 0x230   : > { %s728_s21 = smov %s620_s24  ;;  %17 = sbr.rel (!%p15_p2) target bundleno = 3 (0x3), region = 75 }
 0x235   :  { %377 = vsyncpa [#allocation3], 1 }
 0x236   :  { %379 = vsyncpa [#allocation3 + $0x1], 1 }

// kernel: dino_with_segmentation.11
= control target key start
LH: loop header
LB: loop body
LE: loop exit
PB: predicated region body
PF: predicated region fallthrough
CT: control target
= control target key end

     0   :  { %s779_s24 = smov 0   ;;  %s871_s0 = inlined_call_operand.vmem [shape: f32[2,17,32], index: 0, kind: input, shape index: {}]   ;;  %s872_s1 = inlined_call_operand.vmem [shape: f32[1,32], index: 1, kind: input, shape index: {}]   ;;  %s873_s2 = inlined_call_operand.vmem [shape: f32[1,32], index: 2, kind: input, shape index: {}]   ;;  %s874_s3 = inlined_call_operand.vmem [shape: bf16[32,128], index: 3, kind: input, shape index: {}]   ;;  %s875_s4 = inlined_call_operand.vmem [shape: f32[1,128], index: 4, kind: input, shape index: {}]   ;;  %s876_s5 = inlined_call_operand.vmem [shape: bf16[128,32], index: 5, kind: input, shape index: {}]   ;;  %s877_s6 = inlined_call_operand.vmem [shape: f32[1,32], index: 6, kind: input, shape index: {}]   ;;  %s878_s7 = inlined_call_operand.vmem [shape: f32[2,17,32], index: 7, kind: output, shape index: {}]  }
   0x1 LB: > { %s633_s25 = sadd.s32 4294967295, %s737_s24   ;;  %p637_p0 = scmp.ge.s32.totalorder %s737_s24, 1  ;;  %s737_s24 = sphi %s779_s24, %s17_s24  }
   0x2   : > { %p237_p1 = scmp.lt.s32.totalorder %s737_s24, 3 }
   0x4   : > { %p238_p2 = pnand %p637_p0, %p237_p1 }
   0x5   : > { %p269_p3 = scmp.lt.s32.totalorder (!%p238_p2), %s633_s25, 1 }
   0x6   : > { %241 = sbr.rel (%p238_p2) target bundleno = 770 (0x302), region = 48 }
   0xb   : > { %s880_s25 = smov (!%p269_p3, %s633_s25), 1  ;;  %vm283_vm0 = vcmask 261120   ;;  %vm290_vm1 = vcmask 253952   ;;  %v709_v21 = vld [vmem:[%s874_s3 + $0x8] sm:$0xff]   ;;  %v710_v22 = vld [vmem:[%s874_s3] sm:$0xff]   ;;  %v711_v48 = vld [vmem:[%s876_s5 + $0x38] sm:$0xff]  }
   0xc   : > { %s700_s26 = smul.u32 24, %s880_s25  ;;  %672 = vmatprep.subr.bf16.mxu0 %v709_v21  ;;  %v640_v34 = vld [vmem:[%s872_s1] ss:$0 sm:$0xff]  ;;  %680 = vmatprep.subr.bf16.mxu1 %v711_v48  ;;  %v712_v49 = vld [vmem:[%s876_s5 + $0x30] sm:$0xff]   ;;  %v713_v50 = vld [vmem:[%s876_s5 + $0x28] sm:$0xff]  }
   0xd   : > { %673 = vmatpush3.bf16.msra.mxu0 %v709_v21  ;;  %v641_v40 = vld [vmem:[%s873_s2] ss:$0 sm:$0xff]  ;;  %681 = vmatpush3.bf16.msra.mxu1 %v711_v48  ;;  %v715_v52 = vld [vmem:[%s876_s5 + $0x18] sm:$0xff]   ;;  %v716_v53 = vld [vmem:[%s876_s5 + $0x10] sm:$0xff]  }
   0xe   : > { %s273_s29 = scalar_lea.vmem %s871_s0, %s700_s26  ;;  %674 = vmatprep.subr.bf16.mxu0 %v710_v22  ;;  %682 = vmatprep.subr.bf16.mxu1 %v712_v49  ;;  %v714_v51 = vld [vmem:[%s876_s5 + $0x20] sm:$0xff]   ;;  %v717_v54 = vld [vmem:[%s876_s5 + $0x8] sm:$0xff]   ;;  %s278_s17 = scalar_lea.vmem %s878_s7, %s700_s26 }
   0xf   : > { %v795_v0 = vld [vmem:[%s273_s29] sm:$0xff]  ;;  %v797_v1 = vld [vmem:[%s273_s29 + $0x10] sm:$0x1]  ;;  %v799_v2 = vld [vmem:[%s273_s29 + $0x8] sm:$0xff] }
  0x10   : > { %v284_v3 = vsel %vm283_vm0, %v795_v0, 0.0  ;;  %v291_v4 = vsel %vm290_vm1, %v797_v1, 0.0  ;;  %v287_v5 = vsel %vm283_vm0, %v799_v2, 0.0  ;;  %v718_v55 = vld [vmem:[%s876_s5] sm:$0xff]  }
  0x11   : > { %285 = vadd.xlane.f32.xlu0 %v284_v3  ;;  %292 = vadd.xlane.f32.xlu1 %v291_v4  ;;  %v642_v56 = vld [vmem:[%s875_s4] ss:$0 sm:$0xff] }
  0x12   : > { %675 = vmatpush3.bf16.msra.mxu0 %v710_v22  ;;  %683 = vmatpush3.bf16.msra.mxu1 %v712_v49 }
  0x13   : > { %684 = vmatprep.subr.bf16.mxu1 %v713_v50 }
  0x15   : > { %288 = vadd.xlane.f32.xlu0 %v287_v5 }
  0x16   : > { %685 = vmatpush3.bf16.msra.mxu1 %v713_v50 }
  0x17   : > { %686 = vmatprep.subr.bf16.mxu1 %v714_v51 }
  0x1a   : > { %687 = vmatpush3.bf16.msra.mxu1 %v714_v51 }
  0x1b   : > { %688 = vmatprep.subr.bf16.mxu1 %v715_v52 }
  0x1e   : > { %689 = vmatpush3.bf16.msra.mxu1 %v715_v52 }
  0x1f   : > { %690 = vmatprep.subr.bf16.mxu1 %v716_v53 }
  0x22   : > { %691 = vmatpush3.bf16.msra.mxu1 %v716_v53 }
  0x23   : > { %692 = vmatprep.subr.bf16.mxu1 %v717_v54 }
  0x26   : > { %693 = vmatpush3.bf16.msra.mxu1 %v717_v54 }
  0x27   : > { %694 = vmatprep.subr.bf16.mxu1 %v718_v55 }
  0x2a   : > { %695 = vmatpush3.bf16.msra.mxu1 %v718_v55 }
  0x9a   : > { %v286_v6 = vpop.xlane.xlu0 %285  ;;  %v293_v7 = vpop.xlane.xlu1 %292 }
  0x9b   : > { %v295_v8 = vmul.f32 0.03125, %v286_v6  ;;  %v297_v9 = vmul.f32 0.03125, %v293_v7 }
  0x9d   : > { %v298_v10 = vsub.f32 %v795_v0, %v295_v8  ;;  %v300_v11 = vsub.f32 %v797_v1, %v297_v9 }
  0x9e   : > { %v289_v12 = vpop.xlane.xlu0 %288 }
  0x9f   : > { %v296_v13 = vmul.f32 0.03125, %v289_v12  ;;  %v301_v14 = vmul.f32 %v298_v10, %v298_v10  ;;  %v303_v15 = vmul.f32 %v300_v11, %v300_v11 }
  0xa1   : > { %v299_v16 = vsub.f32 %v799_v2, %v296_v13  ;;  %v304_v17 = vsel %vm283_vm0, %v301_v14, 0.0  ;;  %v310_v18 = vsel %vm290_vm1, %v303_v15, 0.0 }
  0xa2   : > { %305 = vadd.xlane.f32.xlu1 %v304_v17 }
  0xa3   : > { %v302_v19 = vmul.f32 %v299_v16, %v299_v16 }
  0xa5   : > { %v307_v20 = vsel %vm283_vm0, %v302_v19, 0.0 }
  0xa6   : > { %311 = vadd.xlane.f32.xlu1 %v310_v18  ;;  %308 = vadd.xlane.f32.xlu0 %v307_v20 }
 0x12b   : > { %v306_v23 = vpop.xlane.xlu1 %305 }
 0x12c   : > { %v313_v24 = vmul.f32 0.03125, %v306_v23 }
 0x12e   : > { %v316_v25 = vadd.f32 1e-06, %v313_v24 }
 0x12f   : > { %v312_v26 = vpop.xlane.xlu1 %311  ;;  %v309_v27 = vpop.xlane.xlu0 %308 }
 0x130   : > { %719 = vrsqrt.f32 %v316_v25  ;;  %v315_v28 = vmul.f32 0.03125, %v312_v26  ;;  %v314_v29 = vmul.f32 0.03125, %v309_v27 }
 0x132   : > { %v318_v30 = vadd.f32 1e-06, %v315_v28  ;;  %v317_v31 = vadd.f32 1e-06, %v314_v29 }
 0x134   : > { %721 = vrsqrt.f32 %v318_v30 }
 0x135   : > { %723 = vrsqrt.f32 %v317_v31 }
 0x13d   : > { %v720_v32 = vpop.eup %719 }
 0x13e   : > { %v322_v33 = vmul.f32 %v720_v32, %v298_v10  ;;  %v647_v32 = vld [vmem:[%s877_s6] ss:$0 sm:$0xff] }
 0x140   : > { %v332_v39 = vmul.f32 %v640_v34, %v322_v33 }
 0x141   : > { %v722_v35 = vpop.eup %721 }
 0x142   : > { %v724_v36 = vpop.eup %723  ;;  %v324_v37 = vmul.f32 %v722_v35, %v300_v11  ;;  %v342_v44 = vadd.f32 %v641_v40, %v332_v39 }
 0x143   : > { %v323_v38 = vmul.f32 %v724_v36, %v299_v16 }
 0x144   : > { %v334_v41 = vmul.f32 %v640_v34, %v324_v37 }
 0x145   : > { %v333_v42 = vmul.f32 %v640_v34, %v323_v38 }
 0x146   : > { %v344_v43 = vadd.f32 %v641_v40, %v334_v41 }
 0x147   : > { %v343_v45 = vadd.f32 %v641_v40, %v333_v42 }
 0x148   : > { %v346_v46 = vpack.c.bf16 %v344_v43, %v344_v43 }
 0x149   : > { %v345_v47 = vpack.c.bf16 %v343_v45, %v342_v44 }
 0x14b   : > { %676 = vmatprep.mubr.msk.bf16.mxu0 %vm283_vm0, %v345_v47 }
 0x14c   : > { %677 = vmatmul.mubr.msk.bf16.vlgmr.msra.gmra.mxu0 %vm283_vm0, %v346_v46 }
 0x20c   : > { %v678_v57 = vpop.f32.mrf.mxu0 }
 0x20d   : > { %v419_v58 = vadd.f32 %v678_v57, %v642_v56 }
 0x20e   : > { %v410_v59 = vpop.f32.mrf.mxu0 }
 0x20f   : > { %v426_v60 = vmul.f32 %v419_v58, %v419_v58  ;;  %v411_v61 = vadd.f32 %v642_v56, %v410_v59 }
 0x210   : > { %v679_v62 = vpop.f32.mrf.mxu0 }
 0x211   : > { %v429_v63 = vmul.f32 %v426_v60, %v419_v58  ;;  %v424_v3 = vmul.f32 %v411_v61, %v411_v61 }
 0x212   : > { %v413_v4 = vpop.f32.mrf.mxu0 }
 0x213   : > { %v432_v5 = vmul.f32 0.044715, %v429_v63  ;;  %v427_v6 = vmul.f32 %v424_v3, %v411_v61  ;;  %v414_v7 = vadd.f32 %v642_v56, %v413_v4 }
 0x215   : > { %v435_v8 = vadd.f32 %v432_v5, %v419_v58  ;;  %v430_v9 = vmul.f32 0.044715, %v427_v6  ;;  %v425_v10 = vmul.f32 %v414_v7, %v414_v7 }
 0x217   : > { %v438_v11 = vmul.f32 0.7978846, %v435_v8  ;;  %v433_v12 = vadd.f32 %v430_v9, %v411_v61  ;;  %v428_v13 = vmul.f32 %v425_v10, %v414_v7 }
 0x219   : > { %725 = vtanh.f32 %v438_v11  ;;  %v431_v14 = vmul.f32 0.044715, %v428_v13  ;;  %v436_v15 = vmul.f32 0.7978846, %v433_v12 }
 0x21b   : > { %v434_v16 = vadd.f32 %v431_v14, %v414_v7  ;;  %727 = vtanh.f32 %v436_v15 }
 0x21d   : > { %v437_v17 = vmul.f32 0.7978846, %v434_v16 }
 0x21f   : > { %729 = vtanh.f32 %v437_v17 }
 0x226   : > { %v726_v18 = vpop.eup %725 }
 0x227   : > { %v444_v20 = vadd.f32 1.0, %v726_v18 }
 0x228   : > { %v728_v19 = vpop.eup %727 }
 0x229   : > { %v442_v21 = vadd.f32 1.0, %v728_v19  ;;  %v447_v23 = vmul.f32 0.5, %v444_v20 }
 0x22b   : > { %v445_v25 = vmul.f32 0.5, %v442_v21  ;;  %v450_v27 = vmul.f32 %v447_v23, %v419_v58 }
 0x22c   : > { %v730_v22 = vpop.eup %729 }
 0x22d   : > { %v443_v24 = vadd.f32 1.0, %v730_v22  ;;  %v448_v28 = vmul.f32 %v445_v25, %v411_v61  ;;  %v452_v31 = vpack.c.bf16 %v450_v27, %v450_v27 }
 0x22f   : > { %v446_v26 = vmul.f32 0.5, %v443_v24 }
 0x231   : > { %v449_v29 = vmul.f32 %v446_v26, %v414_v7 }
 0x233   : > { %v451_v30 = vpack.c.bf16 %v449_v29, %v448_v28 }
 0x235   : > { %696 = vmatprep.mubr.bf16.mxu1 %v451_v30 }
 0x236   : > { %697 = vmatmul.mubr.bf16.vlgmr.msra.gmra.mxu1 %v452_v31 }
 0x2f6   : > { %v698_v33 = vpop.f32.mrf.mxu1 }
 0x2f7   : > { %v567_v34 = vadd.f32 %v698_v33, %v647_v32 }
 0x2f8   : > { %v558_v35 = vpop.f32.mrf.mxu1 }
 0x2f9   : > { %v574_v36 = vadd.f32 %v567_v34, %v797_v1  ;;  %v559_v37 = vadd.f32 %v647_v32, %v558_v35 }
 0x2fa   : > { %v699_v38 = vpop.f32.mrf.mxu1 }
 0x2fb   : > { %577 = vst.msk [vmem:[%s278_s17 + $0x10] sm:$0x1] %vm290_vm1, %v574_v36  ;;  %v572_v39 = vadd.f32 %v559_v37, %v795_v0 }
 0x2fc   : > { %v561_v40 = vpop.f32.mrf.mxu1 }
 0x2fd   : > { %575 = vst.msk [vmem:[%s278_s17] sm:$0xff] %vm283_vm0, %v572_v39  ;;  %v562_v41 = vadd.f32 %v647_v32, %v561_v40 }
 0x2ff   : > { %v573_v42 = vadd.f32 %v562_v41, %v799_v2 }
 0x301   : > { %576 = vst.msk [vmem:[%s278_s17 + $0x8] sm:$0xff] %vm283_vm0, %v573_v42 }
 0x302 PF: > { %s17_s24 = sadd.s32 1, %s737_s24  }
 0x303   : > { %p14_p4 = scmp.ge.s32.totalorder %s17_s24, 4  }
 0x305   :  { %16 = sbr.rel (!%p14_p4) target bundleno = 1 (0x1), region = 78 }

</bundles_post_ra>
